<compile_context>
chip_gen: v7x
topology: tpu7x:2x2x1
jax: 0.10.0
libtpu: 0.0.40
codegen_flags: <defaults>
</compile_context>

<pallas_src>
import functools

import jax
import jax.numpy as jnp
from jax.experimental import pallas as pl
from jax.experimental.pallas import tpu as pltpu


def _round_up(n: int, m: int) -> int:
    return (n + m - 1) // m * m


def _lstm_chunk_kernel(gx_ref, b_ref, whh_ref, h0_ref, c0_ref,
                       out_ref, hn_ref, cn_ref,
                       h_scr, c_scr, *, t_chunk, t_total, hp):
    """One T-chunk of the LSTM recurrence.

    gx_ref : (t_chunk, Bp, 4*Hp)  precomputed x @ W_ih^T (no bias), compute dtype
    b_ref  : (1, 4*Hp) f32        b_ih + b_hh, gate-blocked & lane padded
    whh_ref: (Hp, 4*Hp)           compute dtype, gate-blocked & lane padded
    h0/c0  : (Bp, Hp) f32         initial state
    out_ref: (t_chunk, Bp, Hp)    hidden states for this chunk
    hn/cn  : (Bp, Hp)             final state, written once on the last step
    h_scr/c_scr : (Bp, Hp) f32    persistent carry across grid steps
    """
    k = pl.program_id(0)

    @pl.when(k == 0)
    def _():
        h_scr[...] = h0_ref[...]
        c_scr[...] = c0_ref[...]

    w_hh = whh_ref[...]
    bias = b_ref[...]

    h = h_scr[...]
    c = c_scr[...]

    needs_mask = (t_total % t_chunk) != 0
    base = k * t_chunk

    # Fully unrolled: t_chunk is small and static, so the scheduler sees the
    # whole dependence chain of the chunk.
    for t in range(t_chunk):
        gates = (gx_ref[t].astype(jnp.float32) + bias
                 + jnp.dot(h.astype(w_hh.dtype), w_hh,
                           preferred_element_type=jnp.float32))
        # PyTorch gate ordering: i, f, g, o.  Each gate owns a lane-aligned
        # Hp-wide (multiple of 128) block -> clean, unmasked vreg slices.
        i = jax.nn.sigmoid(gates[:, 0 * hp:1 * hp])
        f = jax.nn.sigmoid(gates[:, 1 * hp:2 * hp])
        g = jnp.tanh(gates[:, 2 * hp:3 * hp])
        o = jax.nn.sigmoid(gates[:, 3 * hp:4 * hp])
        c_new = f * c + i * g
        h_new = o * jnp.tanh(c_new)
        if needs_mask:
            valid = (base + t) < t_total          # padded tail steps are no-ops
            h = jnp.where(valid, h_new, h)
            c = jnp.where(valid, c_new, c)
        else:
            h, c = h_new, c_new
        out_ref[t] = h.astype(out_ref.dtype)      # lane-dense (Bp, Hp) store

    h_scr[...] = h
    c_scr[...] = c

    @pl.when(k == pl.num_programs(0) - 1)
    def _():
        hn_ref[...] = h.astype(hn_ref.dtype)
        cn_ref[...] = c.astype(cn_ref.dtype)


@functools.partial(jax.jit, static_argnames=("compute_dtype",))
def encoder_forward(x, h0, c0, w_ih, w_hh, b_ih, b_hh,
                    compute_dtype=jnp.bfloat16):
    """Pallas LSTM forward matching PyTorch nn.LSTM (single layer).

    x:          (T, B, D_in)
    h0, c0:     (1, B, H)
    w_ih:       (4H, D_in)   (PyTorch layout, gate order i,f,g,o)
    w_hh:       (4H, H)
    b_ih, b_hh: (4H,)
    returns: output (T, B, H), (h_n, c_n) each (1, B, H)
    """
    T, B, D = x.shape
    H = h0.shape[-1]
    f32 = jnp.float32
    Bp = _round_up(B, 8)        # full f32 sublanes
    Hp = _round_up(H, 128)      # each gate gets a lane-aligned block

    # Gate-blocked, lane-padded parameters:
    #   wih_t[d, k*Hp + m] = w_ih[k*H + m, d]   (m < H, zero otherwise)
    #   whh_t[j, k*Hp + m] = w_hh[k*H + m, j]   (j < H and m < H, else zero)
    wih_g = jnp.transpose(w_ih.reshape(4, H, D), (2, 0, 1)).astype(compute_dtype)
    wih_t = (jnp.zeros((D, 4, Hp), compute_dtype).at[:, :, :H].set(wih_g)
             .reshape(D, 4 * Hp))
    whh_g = jnp.transpose(w_hh.reshape(4, H, H), (2, 0, 1)).astype(compute_dtype)
    whh_t = (jnp.zeros((Hp, 4, Hp), compute_dtype).at[:H, :, :H].set(whh_g)
             .reshape(Hp, 4 * Hp))
    bias = (jnp.zeros((1, 4, Hp), f32).at[:, :, :H]
            .set((b_ih + b_hh).astype(f32).reshape(1, 4, H))
            .reshape(1, 4 * Hp))

    # Input projection outside the kernel: K = D_in is tiny, XLA handles it
    # fine and the kernel then only streams lane-dense 4*Hp-wide data.
    x_p = jnp.zeros((T, Bp, D), compute_dtype).at[:, :B, :].set(
        x.astype(compute_dtype))
    prec = (jax.lax.Precision.HIGHEST if compute_dtype == jnp.float32
            else jax.lax.Precision.DEFAULT)
    gx = jnp.einsum("tbd,dg->tbg", x_p, wih_t, precision=prec,
                    preferred_element_type=jnp.float32).astype(compute_dtype)

    # Time-chunking: bound VMEM and let BlockSpec double-buffering hide the
    # gx prefetch / out writeback under the recurrence of the current chunk.
    out_dtype = x.dtype
    gx_elt = jnp.dtype(compute_dtype).itemsize
    out_elt = jnp.dtype(out_dtype).itemsize
    per_t_stream = Bp * 4 * Hp * gx_elt + Bp * Hp * out_elt
    stream_budget = 16 * 1024 * 1024            # pipelined window, any TPU gen
    unroll_cap = 32 if Hp <= 256 else (16 if Hp <= 512 else 8)
    tc = int(max(1, min(T, unroll_cap, stream_budget // (2 * per_t_stream))))
    Tp = _round_up(T, tc)
    num_chunks = Tp // tc
    if Tp != T:
        gx = jnp.zeros((Tp, Bp, 4 * Hp), compute_dtype).at[:T].set(gx)

    h0_p = jnp.zeros((Bp, Hp), f32).at[:B, :H].set(h0[0].astype(f32))
    c0_p = jnp.zeros((Bp, Hp), f32).at[:B, :H].set(c0[0].astype(f32))

    resident = (Hp * 4 * Hp * gx_elt            # W_hh
                + 4 * Hp * 4                    # bias
                + 2 * Bp * Hp * 4               # h0, c0
                + 2 * Bp * Hp * out_elt         # h_n, c_n
                + 2 * Bp * Hp * 4)              # h/c scratch
    streamed = 2 * tc * per_t_stream            # double-buffered gx + out
    vmem_limit = int(min(64 * 1024 * 1024,
                         max(32 * 1024 * 1024, 2 * (resident + streamed))))

    kernel = functools.partial(_lstm_chunk_kernel,
                               t_chunk=tc, t_total=T, hp=Hp)

    out_p, hn_p, cn_p = pl.pallas_call(
        kernel,
        grid=(num_chunks,),
        in_specs=[
            pl.BlockSpec((tc, Bp, 4 * Hp), lambda k: (k, 0, 0)),   # gx chunk
            pl.BlockSpec((1, 4 * Hp), lambda k: (0, 0)),           # bias
            pl.BlockSpec((Hp, 4 * Hp), lambda k: (0, 0)),          # W_hh
            pl.BlockSpec((Bp, Hp), lambda k: (0, 0)),              # h0
            pl.BlockSpec((Bp, Hp), lambda k: (0, 0)),              # c0
        ],
        out_specs=(
            pl.BlockSpec((tc, Bp, Hp), lambda k: (k, 0, 0)),       # output chunk
            pl.BlockSpec((Bp, Hp), lambda k: (0, 0)),              # h_n (resident)
            pl.BlockSpec((Bp, Hp), lambda k: (0, 0)),              # c_n (resident)
        ),
        out_shape=(
            jax.ShapeDtypeStruct((Tp, Bp, Hp), out_dtype),
            jax.ShapeDtypeStruct((Bp, Hp), out_dtype),
            jax.ShapeDtypeStruct((Bp, Hp), out_dtype),
        ),
        scratch_shapes=[pltpu.VMEM((Bp, Hp), f32),
                        pltpu.VMEM((Bp, Hp), f32)],
        compiler_params=pltpu.CompilerParams(
            dimension_semantics=("arbitrary",),
            vmem_limit_bytes=vmem_limit),
    )(gx, bias, whh_t, h0_p, c0_p)

    # Slice padding off.
    output = out_p[:T, :B, :H]
    h_n = hn_p[None, :B, :H]
    c_n = cn_p[None, :B, :H]
    return output, (h_n, c_n)


def _reference_lstm(x, h0, c0, w_ih, w_hh, b_ih, b_hh):
    """Pure-JAX reference (lax.scan) mirroring PyTorch nn.LSTM semantics."""
    H = h0.shape[-1]

    def step(carry, x_t):
        h, c = carry
        gates = x_t @ w_ih.T + h @ w_hh.T + b_ih + b_hh
        i = jax.nn.sigmoid(gates[:, 0 * H:1 * H])
        f = jax.nn.sigmoid(gates[:, 1 * H:2 * H])
        g = jnp.tanh(gates[:, 2 * H:3 * H])
        o = jax.nn.sigmoid(gates[:, 3 * H:4 * H])
        c_new = f * c + i * g
        h_new = o * jnp.tanh(c_new)
        return (h_new, c_new), h_new

    (h_n, c_n), outs = jax.lax.scan(step, (h0[0], c0[0]), x)
    return outs, (h_n[None], c_n[None])


if __name__ == "__main__":
    # Small shapes consistent with Encoder's forward.
    T, B, D_in, H = 8, 4, 8, 32

    key = jax.random.PRNGKey(0)
    k_x, k_wih, k_whh, k_bih, k_bhh = jax.random.split(key, 5)

    # PyTorch nn.LSTM init: U(-1/sqrt(H), 1/sqrt(H)) for all params.
    bound = 1.0 / (H ** 0.5)
    x = jax.random.normal(k_x, (T, B, D_in), dtype=jnp.float32)
    w_ih = jax.random.uniform(k_wih, (4 * H, D_in), minval=-bound, maxval=bound,
                              dtype=jnp.float32)
    w_hh = jax.random.uniform(k_whh, (4 * H, H), minval=-bound, maxval=bound,
                              dtype=jnp.float32)
    b_ih = jax.random.uniform(k_bih, (4 * H,), minval=-bound, maxval=bound,
                              dtype=jnp.float32)
    b_hh = jax.random.uniform(k_bhh, (4 * H,), minval=-bound, maxval=bound,
                              dtype=jnp.float32)

    # Encoder.init_hidden: zero initial hidden/cell state, (num_layers=1, B, H).
    h0 = jnp.zeros((1, B, H), dtype=jnp.float32)
    c0 = jnp.zeros((1, B, H), dtype=jnp.float32)

    ref_out, (ref_hn, ref_cn) = _reference_lstm(x, h0, c0, w_ih, w_hh, b_ih, b_hh)

    # Exact-precision path (f32 matmuls) -> tight check.
    out32, (hn32, cn32) = encoder_forward(x, h0, c0, w_ih, w_hh, b_ih, b_hh,
                                          compute_dtype=jnp.float32)
    jax.block_until_ready((out32, hn32, cn32))
    assert out32.shape == (T, B, H) and hn32.shape == (1, B, H)
    assert jnp.allclose(out32, ref_out, atol=1e-5), "f32 output mismatch"
    assert jnp.allclose(hn32, ref_hn, atol=1e-5), "f32 h_n mismatch"
    assert jnp.allclose(cn32, ref_cn, atol=1e-5), "f32 c_n mismatch"

    # Default fast path (bf16 MXU operands + bf16 gx stream, f32 accumulation).
    out_bf, (hn_bf, cn_bf) = encoder_forward(x, h0, c0, w_ih, w_hh, b_ih, b_hh)
    jax.block_until_ready((out_bf, hn_bf, cn_bf))
    assert jnp.allclose(out_bf, ref_out, atol=5e-2, rtol=5e-2), "bf16 output mismatch"
    assert jnp.allclose(hn_bf, ref_hn, atol=5e-2, rtol=5e-2), "bf16 h_n mismatch"
    assert jnp.allclose(cn_bf, ref_cn, atol=1e-1, rtol=5e-2), "bf16 c_n mismatch"

    print("KERNEL_OK")
</pallas_src>

<mosaic_0001>
module attributes {stable_mosaic.version = 11 : i64} {
  func.func @_lstm_chunk_kernel(%arg0: i32, %arg1: memref<8x8x512xf32, #tpu.memory_space<vmem>>, %arg2: memref<1x512xf32, #tpu.memory_space<vmem>>, %arg3: memref<128x512xf32, #tpu.memory_space<vmem>>, %arg4: memref<8x128xf32, #tpu.memory_space<vmem>>, %arg5: memref<8x128xf32, #tpu.memory_space<vmem>>, %arg6: memref<8x8x128xf32, #tpu.memory_space<vmem>>, %arg7: memref<8x128xf32, #tpu.memory_space<vmem>>, %arg8: memref<8x128xf32, #tpu.memory_space<vmem>>, %arg9: memref<8x128xf32, #tpu.memory_space<vmem>>, %arg10: memref<8x128xf32, #tpu.memory_space<vmem>>) attributes {dimension_semantics = [#tpu.dimension_semantics<arbitrary>], iteration_bounds = array<i64: 1>, scalar_prefetch = 0 : i64, scratch_operands = 2 : i64, tpu.core_type = #tpu.core_type<tc>, window_params = [{transform_indices = @transform_0, window_bounds = array<i64: 8, 8, 512>}, {pipeline_mode = #tpu.pipeline_mode<synchronous>, transform_indices = @transform_1, window_bounds = array<i64: 1, 512>}, {pipeline_mode = #tpu.pipeline_mode<synchronous>, transform_indices = @transform_2, window_bounds = array<i64: 128, 512>}, {pipeline_mode = #tpu.pipeline_mode<synchronous>, transform_indices = @transform_3, window_bounds = array<i64: 8, 128>}, {pipeline_mode = #tpu.pipeline_mode<synchronous>, transform_indices = @transform_4, window_bounds = array<i64: 8, 128>}, {transform_indices = @transform_5, window_bounds = array<i64: 8, 8, 128>}, {pipeline_mode = #tpu.pipeline_mode<synchronous>, transform_indices = @transform_6, window_bounds = array<i64: 8, 128>}, {pipeline_mode = #tpu.pipeline_mode<synchronous>, transform_indices = @transform_7, window_bounds = array<i64: 8, 128>}]} {
    %c0_i32 = arith.constant 0 : i32
    %0 = arith.cmpi eq, %arg0, %c0_i32 : i32
    %1 = arith.extui %0 : i1 to i32
    %c0_i32_0 = arith.constant 0 : i32
    %2 = arith.cmpi ne, %1, %c0_i32_0 : i32
    scf.if %2 {
      %c0_86 = arith.constant 0 : index
      %c0_87 = arith.constant 0 : index
      %284 = vector.load %arg4[%c0_86, %c0_87] : memref<8x128xf32, #tpu.memory_space<vmem>>, vector<8x128xf32>
      %c0_88 = arith.constant 0 : index
      %c0_89 = arith.constant 0 : index
      %285 = vector.load %arg9[%c0_88, %c0_89] : memref<8x128xf32, #tpu.memory_space<vmem>>, vector<8x128xf32>
      tpu.vector_store %arg9[%c0_88, %c0_89], %284 {strides = array<i32>} : memref<8x128xf32, #tpu.memory_space<vmem>>, vector<8x128xf32>,
      %c0_90 = arith.constant 0 : index
      %c0_91 = arith.constant 0 : index
      %286 = vector.load %arg5[%c0_90, %c0_91] : memref<8x128xf32, #tpu.memory_space<vmem>>, vector<8x128xf32>
      %c0_92 = arith.constant 0 : index
      %c0_93 = arith.constant 0 : index
      %287 = vector.load %arg10[%c0_92, %c0_93] : memref<8x128xf32, #tpu.memory_space<vmem>>, vector<8x128xf32>
      tpu.vector_store %arg10[%c0_92, %c0_93], %286 {strides = array<i32>} : memref<8x128xf32, #tpu.memory_space<vmem>>, vector<8x128xf32>,
    } else {
    }
    %c0 = arith.constant 0 : index
    %c0_1 = arith.constant 0 : index
    %3 = vector.load %arg3[%c0, %c0_1] : memref<128x512xf32, #tpu.memory_space<vmem>>, vector<128x512xf32>
    %c0_2 = arith.constant 0 : index
    %c0_3 = arith.constant 0 : index
    %4 = vector.load %arg2[%c0_2, %c0_3] : memref<1x512xf32, #tpu.memory_space<vmem>>, vector<1x512xf32>
    %c0_4 = arith.constant 0 : index
    %c0_5 = arith.constant 0 : index
    %5 = vector.load %arg9[%c0_4, %c0_5] : memref<8x128xf32, #tpu.memory_space<vmem>>, vector<8x128xf32>
    %c0_6 = arith.constant 0 : index
    %c0_7 = arith.constant 0 : index
    %6 = vector.load %arg10[%c0_6, %c0_7] : memref<8x128xf32, #tpu.memory_space<vmem>>, vector<8x128xf32>
    %c0_8 = arith.constant 0 : index
    %c0_9 = arith.constant 0 : index
    %c0_10 = arith.constant 0 : index
    %7 = vector.load %arg1[%c0_8, %c0_9, %c0_10] : memref<8x8x512xf32, #tpu.memory_space<vmem>>, vector<1x8x512xf32>
    %8 = vector.shape_cast %7 : vector<1x8x512xf32> to vector<8x512xf32>
    %9 = vector.broadcast %4 : vector<1x512xf32> to vector<8x512xf32>
    %10 = arith.addf %8, %9 : vector<8x512xf32>
    %cst = arith.constant dense<0.000000e+00> : vector<8x512xf32>
    %11 = tpu.matmul %5, %3, %cst {dimension_numbers = #tpu.dot_dimension_numbers<[1], [0], [0], [1], [0, 0, 1, 1], [], []>} : vector<8x128xf32>, vector<128x512xf32>, vector<8x512xf32> -> vector<8x512xf32>
    %12 = arith.addf %10, %11 : vector<8x512xf32>
    %13 = vector.extract_strided_slice %12 {offsets = [0, 0], sizes = [8, 128], strides = [1, 1]} : vector<8x512xf32> to vector<8x128xf32>
    %14 = arith.negf %13 : vector<8x128xf32>
    %15 = math.exp %14 : vector<8x128xf32>
    %cst_11 = arith.constant 1.000000e+00 : f32
    %16 = vector.broadcast %cst_11 : f32 to vector<8x128xf32>
    %17 = arith.addf %16, %15 : vector<8x128xf32>
    %18 = arith.divf %16, %17 : vector<8x128xf32>
    %19 = vector.extract_strided_slice %12 {offsets = [0, 128], sizes = [8, 128], strides = [1, 1]} : vector<8x512xf32> to vector<8x128xf32>
    %20 = arith.negf %19 : vector<8x128xf32>
    %21 = math.exp %20 : vector<8x128xf32>
    %cst_12 = arith.constant 1.000000e+00 : f32
    %22 = vector.broadcast %cst_12 : f32 to vector<8x128xf32>
    %23 = arith.addf %22, %21 : vector<8x128xf32>
    %24 = arith.divf %22, %23 : vector<8x128xf32>
    %25 = vector.extract_strided_slice %12 {offsets = [0, 256], sizes = [8, 128], strides = [1, 1]} : vector<8x512xf32> to vector<8x128xf32>
    %26 = math.tanh %25 : vector<8x128xf32>
    %27 = vector.extract_strided_slice %12 {offsets = [0, 384], sizes = [8, 128], strides = [1, 1]} : vector<8x512xf32> to vector<8x128xf32>
    %28 = arith.negf %27 : vector<8x128xf32>
    %29 = math.exp %28 : vector<8x128xf32>
    %cst_13 = arith.constant 1.000000e+00 : f32
    %30 = vector.broadcast %cst_13 : f32 to vector<8x128xf32>
    %31 = arith.addf %30, %29 : vector<8x128xf32>
    %32 = arith.divf %30, %31 : vector<8x128xf32>
    %33 = arith.mulf %24, %6 : vector<8x128xf32>
    %34 = arith.mulf %18, %26 : vector<8x128xf32>
    %35 = arith.addf %33, %34 : vector<8x128xf32>
    %36 = math.tanh %35 : vector<8x128xf32>
    %37 = arith.mulf %32, %36 : vector<8x128xf32>
    %c0_14 = arith.constant 0 : index
    %c0_15 = arith.constant 0 : index
    %c0_16 = arith.constant 0 : index
    %38 = vector.load %arg6[%c0_14, %c0_15, %c0_16] : memref<8x8x128xf32, #tpu.memory_space<vmem>>, vector<1x8x128xf32>
    %39 = vector.shape_cast %38 : vector<1x8x128xf32> to vector<8x128xf32>
    %40 = vector.shape_cast %37 : vector<8x128xf32> to vector<1x8x128xf32>
    tpu.vector_store %arg6[%c0_14, %c0_15, %c0_16], %40 {strides = array<i32>} : memref<8x8x128xf32, #tpu.memory_space<vmem>>, vector<1x8x128xf32>,
    %c1 = arith.constant 1 : index
    %c0_17 = arith.constant 0 : index
    %c0_18 = arith.constant 0 : index
    %41 = vector.load %arg1[%c1, %c0_17, %c0_18] : memref<8x8x512xf32, #tpu.memory_space<vmem>>, vector<1x8x512xf32>
    %42 = vector.shape_cast %41 : vector<1x8x512xf32> to vector<8x512xf32>
    %43 = vector.broadcast %4 : vector<1x512xf32> to vector<8x512xf32>
    %44 = arith.addf %42, %43 : vector<8x512xf32>
    %cst_19 = arith.constant dense<0.000000e+00> : vector<8x512xf32>
    %45 = tpu.matmul %37, %3, %cst_19 {dimension_numbers = #tpu.dot_dimension_numbers<[1], [0], [0], [1], [0, 0, 1, 1], [], []>} : vector<8x128xf32>, vector<128x512xf32>, vector<8x512xf32> -> vector<8x512xf32>
    %46 = arith.addf %44, %45 : vector<8x512xf32>
    %47 = vector.extract_strided_slice %46 {offsets = [0, 0], sizes = [8, 128], strides = [1, 1]} : vector<8x512xf32> to vector<8x128xf32>
    %48 = arith.negf %47 : vector<8x128xf32>
    %49 = math.exp %48 : vector<8x128xf32>
    %cst_20 = arith.constant 1.000000e+00 : f32
    %50 = vector.broadcast %cst_20 : f32 to vector<8x128xf32>
    %51 = arith.addf %50, %49 : vector<8x128xf32>
    %52 = arith.divf %50, %51 : vector<8x128xf32>
    %53 = vector.extract_strided_slice %46 {offsets = [0, 128], sizes = [8, 128], strides = [1, 1]} : vector<8x512xf32> to vector<8x128xf32>
    %54 = arith.negf %53 : vector<8x128xf32>
    %55 = math.exp %54 : vector<8x128xf32>
    %cst_21 = arith.constant 1.000000e+00 : f32
    %56 = vector.broadcast %cst_21 : f32 to vector<8x128xf32>
    %57 = arith.addf %56, %55 : vector<8x128xf32>
    %58 = arith.divf %56, %57 : vector<8x128xf32>
    %59 = vector.extract_strided_slice %46 {offsets = [0, 256], sizes = [8, 128], strides = [1, 1]} : vector<8x512xf32> to vector<8x128xf32>
    %60 = math.tanh %59 : vector<8x128xf32>
    %61 = vector.extract_strided_slice %46 {offsets = [0, 384], sizes = [8, 128], strides = [1, 1]} : vector<8x512xf32> to vector<8x128xf32>
    %62 = arith.negf %61 : vector<8x128xf32>
    %63 = math.exp %62 : vector<8x128xf32>
    %cst_22 = arith.constant 1.000000e+00 : f32
    %64 = vector.broadcast %cst_22 : f32 to vector<8x128xf32>
    %65 = arith.addf %64, %63 : vector<8x128xf32>
    %66 = arith.divf %64, %65 : vector<8x128xf32>
    %67 = arith.mulf %58, %35 : vector<8x128xf32>
    %68 = arith.mulf %52, %60 : vector<8x128xf32>
    %69 = arith.addf %67, %68 : vector<8x128xf32>
    %70 = math.tanh %69 : vector<8x128xf32>
    %71 = arith.mulf %66, %70 : vector<8x128xf32>
    %c1_23 = arith.constant 1 : index
    %c0_24 = arith.constant 0 : index
    %c0_25 = arith.constant 0 : index
    %72 = vector.load %arg6[%c1_23, %c0_24, %c0_25] : memref<8x8x128xf32, #tpu.memory_space<vmem>>, vector<1x8x128xf32>
    %73 = vector.shape_cast %72 : vector<1x8x128xf32> to vector<8x128xf32>
    %74 = vector.shape_cast %71 : vector<8x128xf32> to vector<1x8x128xf32>
    tpu.vector_store %arg6[%c1_23, %c0_24, %c0_25], %74 {strides = array<i32>} : memref<8x8x128xf32, #tpu.memory_space<vmem>>, vector<1x8x128xf32>,
    %c2 = arith.constant 2 : index
    %c0_26 = arith.constant 0 : index
    %c0_27 = arith.constant 0 : index
    %75 = vector.load %arg1[%c2, %c0_26, %c0_27] : memref<8x8x512xf32, #tpu.memory_space<vmem>>, vector<1x8x512xf32>
    %76 = vector.shape_cast %75 : vector<1x8x512xf32> to vector<8x512xf32>
    %77 = vector.broadcast %4 : vector<1x512xf32> to vector<8x512xf32>
    %78 = arith.addf %76, %77 : vector<8x512xf32>
    %cst_28 = arith.constant dense<0.000000e+00> : vector<8x512xf32>
    %79 = tpu.matmul %71, %3, %cst_28 {dimension_numbers = #tpu.dot_dimension_numbers<[1], [0], [0], [1], [0, 0, 1, 1], [], []>} : vector<8x128xf32>, vector<128x512xf32>, vector<8x512xf32> -> vector<8x512xf32>
    %80 = arith.addf %78, %79 : vector<8x512xf32>
    %81 = vector.extract_strided_slice %80 {offsets = [0, 0], sizes = [8, 128], strides = [1, 1]} : vector<8x512xf32> to vector<8x128xf32>
    %82 = arith.negf %81 : vector<8x128xf32>
    %83 = math.exp %82 : vector<8x128xf32>
    %cst_29 = arith.constant 1.000000e+00 : f32
    %84 = vector.broadcast %cst_29 : f32 to vector<8x128xf32>
    %85 = arith.addf %84, %83 : vector<8x128xf32>
    %86 = arith.divf %84, %85 : vector<8x128xf32>
    %87 = vector.extract_strided_slice %80 {offsets = [0, 128], sizes = [8, 128], strides = [1, 1]} : vector<8x512xf32> to vector<8x128xf32>
    %88 = arith.negf %87 : vector<8x128xf32>
    %89 = math.exp %88 : vector<8x128xf32>
    %cst_30 = arith.constant 1.000000e+00 : f32
    %90 = vector.broadcast %cst_30 : f32 to vector<8x128xf32>
    %91 = arith.addf %90, %89 : vector<8x128xf32>
    %92 = arith.divf %90, %91 : vector<8x128xf32>
    %93 = vector.extract_strided_slice %80 {offsets = [0, 256], sizes = [8, 128], strides = [1, 1]} : vector<8x512xf32> to vector<8x128xf32>
    %94 = math.tanh %93 : vector<8x128xf32>
    %95 = vector.extract_strided_slice %80 {offsets = [0, 384], sizes = [8, 128], strides = [1, 1]} : vector<8x512xf32> to vector<8x128xf32>
    %96 = arith.negf %95 : vector<8x128xf32>
    %97 = math.exp %96 : vector<8x128xf32>
    %cst_31 = arith.constant 1.000000e+00 : f32
    %98 = vector.broadcast %cst_31 : f32 to vector<8x128xf32>
    %99 = arith.addf %98, %97 : vector<8x128xf32>
    %100 = arith.divf %98, %99 : vector<8x128xf32>
    %101 = arith.mulf %92, %69 : vector<8x128xf32>
    %102 = arith.mulf %86, %94 : vector<8x128xf32>
    %103 = arith.addf %101, %102 : vector<8x128xf32>
    %104 = math.tanh %103 : vector<8x128xf32>
    %105 = arith.mulf %100, %104 : vector<8x128xf32>
    %c2_32 = arith.constant 2 : index
    %c0_33 = arith.constant 0 : index
    %c0_34 = arith.constant 0 : index
    %106 = vector.load %arg6[%c2_32, %c0_33, %c0_34] : memref<8x8x128xf32, #tpu.memory_space<vmem>>, vector<1x8x128xf32>
    %107 = vector.shape_cast %106 : vector<1x8x128xf32> to vector<8x128xf32>
    %108 = vector.shape_cast %105 : vector<8x128xf32> to vector<1x8x128xf32>
    tpu.vector_store %arg6[%c2_32, %c0_33, %c0_34], %108 {strides = array<i32>} : memref<8x8x128xf32, #tpu.memory_space<vmem>>, vector<1x8x128xf32>,
    %c3 = arith.constant 3 : index
    %c0_35 = arith.constant 0 : index
    %c0_36 = arith.constant 0 : index
    %109 = vector.load %arg1[%c3, %c0_35, %c0_36] : memref<8x8x512xf32, #tpu.memory_space<vmem>>, vector<1x8x512xf32>
    %110 = vector.shape_cast %109 : vector<1x8x512xf32> to vector<8x512xf32>
    %111 = vector.broadcast %4 : vector<1x512xf32> to vector<8x512xf32>
    %112 = arith.addf %110, %111 : vector<8x512xf32>
    %cst_37 = arith.constant dense<0.000000e+00> : vector<8x512xf32>
    %113 = tpu.matmul %105, %3, %cst_37 {dimension_numbers = #tpu.dot_dimension_numbers<[1], [0], [0], [1], [0, 0, 1, 1], [], []>} : vector<8x128xf32>, vector<128x512xf32>, vector<8x512xf32> -> vector<8x512xf32>
    %114 = arith.addf %112, %113 : vector<8x512xf32>
    %115 = vector.extract_strided_slice %114 {offsets = [0, 0], sizes = [8, 128], strides = [1, 1]} : vector<8x512xf32> to vector<8x128xf32>
    %116 = arith.negf %115 : vector<8x128xf32>
    %117 = math.exp %116 : vector<8x128xf32>
    %cst_38 = arith.constant 1.000000e+00 : f32
    %118 = vector.broadcast %cst_38 : f32 to vector<8x128xf32>
    %119 = arith.addf %118, %117 : vector<8x128xf32>
    %120 = arith.divf %118, %119 : vector<8x128xf32>
    %121 = vector.extract_strided_slice %114 {offsets = [0, 128], sizes = [8, 128], strides = [1, 1]} : vector<8x512xf32> to vector<8x128xf32>
    %122 = arith.negf %121 : vector<8x128xf32>
    %123 = math.exp %122 : vector<8x128xf32>
    %cst_39 = arith.constant 1.000000e+00 : f32
    %124 = vector.broadcast %cst_39 : f32 to vector<8x128xf32>
    %125 = arith.addf %124, %123 : vector<8x128xf32>
    %126 = arith.divf %124, %125 : vector<8x128xf32>
    %127 = vector.extract_strided_slice %114 {offsets = [0, 256], sizes = [8, 128], strides = [1, 1]} : vector<8x512xf32> to vector<8x128xf32>
    %128 = math.tanh %127 : vector<8x128xf32>
    %129 = vector.extract_strided_slice %114 {offsets = [0, 384], sizes = [8, 128], strides = [1, 1]} : vector<8x512xf32> to vector<8x128xf32>
    %130 = arith.negf %129 : vector<8x128xf32>
    %131 = math.exp %130 : vector<8x128xf32>
    %cst_40 = arith.constant 1.000000e+00 : f32
    %132 = vector.broadcast %cst_40 : f32 to vector<8x128xf32>
    %133 = arith.addf %132, %131 : vector<8x128xf32>
    %134 = arith.divf %132, %133 : vector<8x128xf32>
    %135 = arith.mulf %126, %103 : vector<8x128xf32>
    %136 = arith.mulf %120, %128 : vector<8x128xf32>
    %137 = arith.addf %135, %136 : vector<8x128xf32>
    %138 = math.tanh %137 : vector<8x128xf32>
    %139 = arith.mulf %134, %138 : vector<8x128xf32>
    %c3_41 = arith.constant 3 : index
    %c0_42 = arith.constant 0 : index
    %c0_43 = arith.constant 0 : index
    %140 = vector.load %arg6[%c3_41, %c0_42, %c0_43] : memref<8x8x128xf32, #tpu.memory_space<vmem>>, vector<1x8x128xf32>
    %141 = vector.shape_cast %140 : vector<1x8x128xf32> to vector<8x128xf32>
    %142 = vector.shape_cast %139 : vector<8x128xf32> to vector<1x8x128xf32>
    tpu.vector_store %arg6[%c3_41, %c0_42, %c0_43], %142 {strides = array<i32>} : memref<8x8x128xf32, #tpu.memory_space<vmem>>, vector<1x8x128xf32>,
    %c4 = arith.constant 4 : index
    %c0_44 = arith.constant 0 : index
    %c0_45 = arith.constant 0 : index
    %143 = vector.load %arg1[%c4, %c0_44, %c0_45] : memref<8x8x512xf32, #tpu.memory_space<vmem>>, vector<1x8x512xf32>
    %144 = vector.shape_cast %143 : vector<1x8x512xf32> to vector<8x512xf32>
    %145 = vector.broadcast %4 : vector<1x512xf32> to vector<8x512xf32>
    %146 = arith.addf %144, %145 : vector<8x512xf32>
    %cst_46 = arith.constant dense<0.000000e+00> : vector<8x512xf32>
    %147 = tpu.matmul %139, %3, %cst_46 {dimension_numbers = #tpu.dot_dimension_numbers<[1], [0], [0], [1], [0, 0, 1, 1], [], []>} : vector<8x128xf32>, vector<128x512xf32>, vector<8x512xf32> -> vector<8x512xf32>
    %148 = arith.addf %146, %147 : vector<8x512xf32>
    %149 = vector.extract_strided_slice %148 {offsets = [0, 0], sizes = [8, 128], strides = [1, 1]} : vector<8x512xf32> to vector<8x128xf32>
    %150 = arith.negf %149 : vector<8x128xf32>
    %151 = math.exp %150 : vector<8x128xf32>
    %cst_47 = arith.constant 1.000000e+00 : f32
    %152 = vector.broadcast %cst_47 : f32 to vector<8x128xf32>
    %153 = arith.addf %152, %151 : vector<8x128xf32>
    %154 = arith.divf %152, %153 : vector<8x128xf32>
    %155 = vector.extract_strided_slice %148 {offsets = [0, 128], sizes = [8, 128], strides = [1, 1]} : vector<8x512xf32> to vector<8x128xf32>
    %156 = arith.negf %155 : vector<8x128xf32>
    %157 = math.exp %156 : vector<8x128xf32>
    %cst_48 = arith.constant 1.000000e+00 : f32
    %158 = vector.broadcast %cst_48 : f32 to vector<8x128xf32>
    %159 = arith.addf %158, %157 : vector<8x128xf32>
    %160 = arith.divf %158, %159 : vector<8x128xf32>
    %161 = vector.extract_strided_slice %148 {offsets = [0, 256], sizes = [8, 128], strides = [1, 1]} : vector<8x512xf32> to vector<8x128xf32>
    %162 = math.tanh %161 : vector<8x128xf32>
    %163 = vector.extract_strided_slice %148 {offsets = [0, 384], sizes = [8, 128], strides = [1, 1]} : vector<8x512xf32> to vector<8x128xf32>
    %164 = arith.negf %163 : vector<8x128xf32>
    %165 = math.exp %164 : vector<8x128xf32>
    %cst_49 = arith.constant 1.000000e+00 : f32
    %166 = vector.broadcast %cst_49 : f32 to vector<8x128xf32>
    %167 = arith.addf %166, %165 : vector<8x128xf32>
    %168 = arith.divf %166, %167 : vector<8x128xf32>
    %169 = arith.mulf %160, %137 : vector<8x128xf32>
    %170 = arith.mulf %154, %162 : vector<8x128xf32>
    %171 = arith.addf %169, %170 : vector<8x128xf32>
    %172 = math.tanh %171 : vector<8x128xf32>
    %173 = arith.mulf %168, %172 : vector<8x128xf32>
    %c4_50 = arith.constant 4 : index
    %c0_51 = arith.constant 0 : index
    %c0_52 = arith.constant 0 : index
    %174 = vector.load %arg6[%c4_50, %c0_51, %c0_52] : memref<8x8x128xf32, #tpu.memory_space<vmem>>, vector<1x8x128xf32>
    %175 = vector.shape_cast %174 : vector<1x8x128xf32> to vector<8x128xf32>
    %176 = vector.shape_cast %173 : vector<8x128xf32> to vector<1x8x128xf32>
    tpu.vector_store %arg6[%c4_50, %c0_51, %c0_52], %176 {strides = array<i32>} : memref<8x8x128xf32, #tpu.memory_space<vmem>>, vector<1x8x128xf32>,
    %c5 = arith.constant 5 : index
    %c0_53 = arith.constant 0 : index
    %c0_54 = arith.constant 0 : index
    %177 = vector.load %arg1[%c5, %c0_53, %c0_54] : memref<8x8x512xf32, #tpu.memory_space<vmem>>, vector<1x8x512xf32>
    %178 = vector.shape_cast %177 : vector<1x8x512xf32> to vector<8x512xf32>
    %179 = vector.broadcast %4 : vector<1x512xf32> to vector<8x512xf32>
    %180 = arith.addf %178, %179 : vector<8x512xf32>
    %cst_55 = arith.constant dense<0.000000e+00> : vector<8x512xf32>
    %181 = tpu.matmul %173, %3, %cst_55 {dimension_numbers = #tpu.dot_dimension_numbers<[1], [0], [0], [1], [0, 0, 1, 1], [], []>} : vector<8x128xf32>, vector<128x512xf32>, vector<8x512xf32> -> vector<8x512xf32>
    %182 = arith.addf %180, %181 : vector<8x512xf32>
    %183 = vector.extract_strided_slice %182 {offsets = [0, 0], sizes = [8, 128], strides = [1, 1]} : vector<8x512xf32> to vector<8x128xf32>
    %184 = arith.negf %183 : vector<8x128xf32>
    %185 = math.exp %184 : vector<8x128xf32>
    %cst_56 = arith.constant 1.000000e+00 : f32
    %186 = vector.broadcast %cst_56 : f32 to vector<8x128xf32>
    %187 = arith.addf %186, %185 : vector<8x128xf32>
    %188 = arith.divf %186, %187 : vector<8x128xf32>
    %189 = vector.extract_strided_slice %182 {offsets = [0, 128], sizes = [8, 128], strides = [1, 1]} : vector<8x512xf32> to vector<8x128xf32>
    %190 = arith.negf %189 : vector<8x128xf32>
    %191 = math.exp %190 : vector<8x128xf32>
    %cst_57 = arith.constant 1.000000e+00 : f32
    %192 = vector.broadcast %cst_57 : f32 to vector<8x128xf32>
    %193 = arith.addf %192, %191 : vector<8x128xf32>
    %194 = arith.divf %192, %193 : vector<8x128xf32>
    %195 = vector.extract_strided_slice %182 {offsets = [0, 256], sizes = [8, 128], strides = [1, 1]} : vector<8x512xf32> to vector<8x128xf32>
    %196 = math.tanh %195 : vector<8x128xf32>
    %197 = vector.extract_strided_slice %182 {offsets = [0, 384], sizes = [8, 128], strides = [1, 1]} : vector<8x512xf32> to vector<8x128xf32>
    %198 = arith.negf %197 : vector<8x128xf32>
    %199 = math.exp %198 : vector<8x128xf32>
    %cst_58 = arith.constant 1.000000e+00 : f32
    %200 = vector.broadcast %cst_58 : f32 to vector<8x128xf32>
    %201 = arith.addf %200, %199 : vector<8x128xf32>
    %202 = arith.divf %200, %201 : vector<8x128xf32>
    %203 = arith.mulf %194, %171 : vector<8x128xf32>
    %204 = arith.mulf %188, %196 : vector<8x128xf32>
    %205 = arith.addf %203, %204 : vector<8x128xf32>
    %206 = math.tanh %205 : vector<8x128xf32>
    %207 = arith.mulf %202, %206 : vector<8x128xf32>
    %c5_59 = arith.constant 5 : index
    %c0_60 = arith.constant 0 : index
    %c0_61 = arith.constant 0 : index
    %208 = vector.load %arg6[%c5_59, %c0_60, %c0_61] : memref<8x8x128xf32, #tpu.memory_space<vmem>>, vector<1x8x128xf32>
    %209 = vector.shape_cast %208 : vector<1x8x128xf32> to vector<8x128xf32>
    %210 = vector.shape_cast %207 : vector<8x128xf32> to vector<1x8x128xf32>
    tpu.vector_store %arg6[%c5_59, %c0_60, %c0_61], %210 {strides = array<i32>} : memref<8x8x128xf32, #tpu.memory_space<vmem>>, vector<1x8x128xf32>,
    %c6 = arith.constant 6 : index
    %c0_62 = arith.constant 0 : index
    %c0_63 = arith.constant 0 : index
    %211 = vector.load %arg1[%c6, %c0_62, %c0_63] : memref<8x8x512xf32, #tpu.memory_space<vmem>>, vector<1x8x512xf32>
    %212 = vector.shape_cast %211 : vector<1x8x512xf32> to vector<8x512xf32>
    %213 = vector.broadcast %4 : vector<1x512xf32> to vector<8x512xf32>
    %214 = arith.addf %212, %213 : vector<8x512xf32>
    %cst_64 = arith.constant dense<0.000000e+00> : vector<8x512xf32>
    %215 = tpu.matmul %207, %3, %cst_64 {dimension_numbers = #tpu.dot_dimension_numbers<[1], [0], [0], [1], [0, 0, 1, 1], [], []>} : vector<8x128xf32>, vector<128x512xf32>, vector<8x512xf32> -> vector<8x512xf32>
    %216 = arith.addf %214, %215 : vector<8x512xf32>
    %217 = vector.extract_strided_slice %216 {offsets = [0, 0], sizes = [8, 128], strides = [1, 1]} : vector<8x512xf32> to vector<8x128xf32>
    %218 = arith.negf %217 : vector<8x128xf32>
    %219 = math.exp %218 : vector<8x128xf32>
    %cst_65 = arith.constant 1.000000e+00 : f32
    %220 = vector.broadcast %cst_65 : f32 to vector<8x128xf32>
    %221 = arith.addf %220, %219 : vector<8x128xf32>
    %222 = arith.divf %220, %221 : vector<8x128xf32>
    %223 = vector.extract_strided_slice %216 {offsets = [0, 128], sizes = [8, 128], strides = [1, 1]} : vector<8x512xf32> to vector<8x128xf32>
    %224 = arith.negf %223 : vector<8x128xf32>
    %225 = math.exp %224 : vector<8x128xf32>
    %cst_66 = arith.constant 1.000000e+00 : f32
    %226 = vector.broadcast %cst_66 : f32 to vector<8x128xf32>
    %227 = arith.addf %226, %225 : vector<8x128xf32>
    %228 = arith.divf %226, %227 : vector<8x128xf32>
    %229 = vector.extract_strided_slice %216 {offsets = [0, 256], sizes = [8, 128], strides = [1, 1]} : vector<8x512xf32> to vector<8x128xf32>
    %230 = math.tanh %229 : vector<8x128xf32>
    %231 = vector.extract_strided_slice %216 {offsets = [0, 384], sizes = [8, 128], strides = [1, 1]} : vector<8x512xf32> to vector<8x128xf32>
    %232 = arith.negf %231 : vector<8x128xf32>
    %233 = math.exp %232 : vector<8x128xf32>
    %cst_67 = arith.constant 1.000000e+00 : f32
    %234 = vector.broadcast %cst_67 : f32 to vector<8x128xf32>
    %235 = arith.addf %234, %233 : vector<8x128xf32>
    %236 = arith.divf %234, %235 : vector<8x128xf32>
    %237 = arith.mulf %228, %205 : vector<8x128xf32>
    %238 = arith.mulf %222, %230 : vector<8x128xf32>
    %239 = arith.addf %237, %238 : vector<8x128xf32>
    %240 = math.tanh %239 : vector<8x128xf32>
    %241 = arith.mulf %236, %240 : vector<8x128xf32>
    %c6_68 = arith.constant 6 : index
    %c0_69 = arith.constant 0 : index
    %c0_70 = arith.constant 0 : index
    %242 = vector.load %arg6[%c6_68, %c0_69, %c0_70] : memref<8x8x128xf32, #tpu.memory_space<vmem>>, vector<1x8x128xf32>
    %243 = vector.shape_cast %242 : vector<1x8x128xf32> to vector<8x128xf32>
    %244 = vector.shape_cast %241 : vector<8x128xf32> to vector<1x8x128xf32>
    tpu.vector_store %arg6[%c6_68, %c0_69, %c0_70], %244 {strides = array<i32>} : memref<8x8x128xf32, #tpu.memory_space<vmem>>, vector<1x8x128xf32>,
    %c7 = arith.constant 7 : index
    %c0_71 = arith.constant 0 : index
    %c0_72 = arith.constant 0 : index
    %245 = vector.load %arg1[%c7, %c0_71, %c0_72] : memref<8x8x512xf32, #tpu.memory_space<vmem>>, vector<1x8x512xf32>
    %246 = vector.shape_cast %245 : vector<1x8x512xf32> to vector<8x512xf32>
    %247 = vector.broadcast %4 : vector<1x512xf32> to vector<8x512xf32>
    %248 = arith.addf %246, %247 : vector<8x512xf32>
    %cst_73 = arith.constant dense<0.000000e+00> : vector<8x512xf32>
    %249 = tpu.matmul %241, %3, %cst_73 {dimension_numbers = #tpu.dot_dimension_numbers<[1], [0], [0], [1], [0, 0, 1, 1], [], []>} : vector<8x128xf32>, vector<128x512xf32>, vector<8x512xf32> -> vector<8x512xf32>
    %250 = arith.addf %248, %249 : vector<8x512xf32>
    %251 = vector.extract_strided_slice %250 {offsets = [0, 0], sizes = [8, 128], strides = [1, 1]} : vector<8x512xf32> to vector<8x128xf32>
    %252 = arith.negf %251 : vector<8x128xf32>
    %253 = math.exp %252 : vector<8x128xf32>
    %cst_74 = arith.constant 1.000000e+00 : f32
    %254 = vector.broadcast %cst_74 : f32 to vector<8x128xf32>
    %255 = arith.addf %254, %253 : vector<8x128xf32>
    %256 = arith.divf %254, %255 : vector<8x128xf32>
    %257 = vector.extract_strided_slice %250 {offsets = [0, 128], sizes = [8, 128], strides = [1, 1]} : vector<8x512xf32> to vector<8x128xf32>
    %258 = arith.negf %257 : vector<8x128xf32>
    %259 = math.exp %258 : vector<8x128xf32>
    %cst_75 = arith.constant 1.000000e+00 : f32
    %260 = vector.broadcast %cst_75 : f32 to vector<8x128xf32>
    %261 = arith.addf %260, %259 : vector<8x128xf32>
    %262 = arith.divf %260, %261 : vector<8x128xf32>
    %263 = vector.extract_strided_slice %250 {offsets = [0, 256], sizes = [8, 128], strides = [1, 1]} : vector<8x512xf32> to vector<8x128xf32>
    %264 = math.tanh %263 : vector<8x128xf32>
    %265 = vector.extract_strided_slice %250 {offsets = [0, 384], sizes = [8, 128], strides = [1, 1]} : vector<8x512xf32> to vector<8x128xf32>
    %266 = arith.negf %265 : vector<8x128xf32>
    %267 = math.exp %266 : vector<8x128xf32>
    %cst_76 = arith.constant 1.000000e+00 : f32
    %268 = vector.broadcast %cst_76 : f32 to vector<8x128xf32>
    %269 = arith.addf %268, %267 : vector<8x128xf32>
    %270 = arith.divf %268, %269 : vector<8x128xf32>
    %271 = arith.mulf %262, %239 : vector<8x128xf32>
    %272 = arith.mulf %256, %264 : vector<8x128xf32>
    %273 = arith.addf %271, %272 : vector<8x128xf32>
    %274 = math.tanh %273 : vector<8x128xf32>
    %275 = arith.mulf %270, %274 : vector<8x128xf32>
    %c7_77 = arith.constant 7 : index
    %c0_78 = arith.constant 0 : index
    %c0_79 = arith.constant 0 : index
    %276 = vector.load %arg6[%c7_77, %c0_78, %c0_79] : memref<8x8x128xf32, #tpu.memory_space<vmem>>, vector<1x8x128xf32>
    %277 = vector.shape_cast %276 : vector<1x8x128xf32> to vector<8x128xf32>
    %278 = vector.shape_cast %275 : vector<8x128xf32> to vector<1x8x128xf32>
    tpu.vector_store %arg6[%c7_77, %c0_78, %c0_79], %278 {strides = array<i32>} : memref<8x8x128xf32, #tpu.memory_space<vmem>>, vector<1x8x128xf32>,
    %c0_80 = arith.constant 0 : index
    %c0_81 = arith.constant 0 : index
    %279 = vector.load %arg9[%c0_80, %c0_81] : memref<8x128xf32, #tpu.memory_space<vmem>>, vector<8x128xf32>
    tpu.vector_store %arg9[%c0_80, %c0_81], %275 {strides = array<i32>} : memref<8x128xf32, #tpu.memory_space<vmem>>, vector<8x128xf32>,
    %c0_82 = arith.constant 0 : index
    %c0_83 = arith.constant 0 : index
    %280 = vector.load %arg10[%c0_82, %c0_83] : memref<8x128xf32, #tpu.memory_space<vmem>>, vector<8x128xf32>
    tpu.vector_store %arg10[%c0_82, %c0_83], %273 {strides = array<i32>} : memref<8x128xf32, #tpu.memory_space<vmem>>, vector<8x128xf32>,
    %c0_i32_84 = arith.constant 0 : i32
    %281 = arith.cmpi eq, %arg0, %c0_i32_84 : i32
    %282 = arith.extui %281 : i1 to i32
    %c0_i32_85 = arith.constant 0 : i32
    %283 = arith.cmpi ne, %282, %c0_i32_85 : i32
    scf.if %283 {
      %c0_86 = arith.constant 0 : index
      %c0_87 = arith.constant 0 : index
      %284 = vector.load %arg7[%c0_86, %c0_87] : memref<8x128xf32, #tpu.memory_space<vmem>>, vector<8x128xf32>
      tpu.vector_store %arg7[%c0_86, %c0_87], %275 {strides = array<i32>} : memref<8x128xf32, #tpu.memory_space<vmem>>, vector<8x128xf32>,
      %c0_88 = arith.constant 0 : index
      %c0_89 = arith.constant 0 : index
      %285 = vector.load %arg8[%c0_88, %c0_89] : memref<8x128xf32, #tpu.memory_space<vmem>>, vector<8x128xf32>
      tpu.vector_store %arg8[%c0_88, %c0_89], %273 {strides = array<i32>} : memref<8x128xf32, #tpu.memory_space<vmem>>, vector<8x128xf32>,
    } else {
    }
    return
  }
  func.func @transform_0(%arg0: i32) -> (i32, i32, i32) {
    %c0_i32 = arith.constant 0 : i32
    %c0_i32_0 = arith.constant 0 : i32
    %c0_i32_1 = arith.constant 0 : i32
    return %arg0, %c0_i32, %c0_i32_0 : i32, i32, i32
  }
  func.func @transform_1(%arg0: i32) -> (i32, i32) {
    %c0_i32 = arith.constant 0 : i32
    %c0_i32_0 = arith.constant 0 : i32
    %c0_i32_1 = arith.constant 0 : i32
    return %c0_i32, %c0_i32_0 : i32, i32
  }
  func.func @transform_2(%arg0: i32) -> (i32, i32) {
    %c0_i32 = arith.constant 0 : i32
    %c0_i32_0 = arith.constant 0 : i32
    %c0_i32_1 = arith.constant 0 : i32
    return %c0_i32, %c0_i32_0 : i32, i32
  }
  func.func @transform_3(%arg0: i32) -> (i32, i32) {
    %c0_i32 = arith.constant 0 : i32
    %c0_i32_0 = arith.constant 0 : i32
    %c0_i32_1 = arith.constant 0 : i32
    return %c0_i32, %c0_i32_0 : i32, i32
  }
  func.func @transform_4(%arg0: i32) -> (i32, i32) {
    %c0_i32 = arith.constant 0 : i32
    %c0_i32_0 = arith.constant 0 : i32
    %c0_i32_1 = arith.constant 0 : i32
    return %c0_i32, %c0_i32_0 : i32, i32
  }
  func.func @transform_5(%arg0: i32) -> (i32, i32, i32) {
    %c0_i32 = arith.constant 0 : i32
    %c0_i32_0 = arith.constant 0 : i32
    %c0_i32_1 = arith.constant 0 : i32
    return %arg0, %c0_i32, %c0_i32_0 : i32, i32, i32
  }
  func.func @transform_6(%arg0: i32) -> (i32, i32) {
    %c0_i32 = arith.constant 0 : i32
    %c0_i32_0 = arith.constant 0 : i32
    %c0_i32_1 = arith.constant 0 : i32
    return %c0_i32, %c0_i32_0 : i32, i32
  }
  func.func @transform_7(%arg0: i32) -> (i32, i32) {
    %c0_i32 = arith.constant 0 : i32
    %c0_i32_0 = arith.constant 0 : i32
    %c0_i32_1 = arith.constant 0 : i32
    return %c0_i32, %c0_i32_0 : i32, i32
  }
}

</mosaic_0001>

<bundles_post_ra>
// kernel: encoder_forward.1
= control target key start
LH: loop header
LB: loop body
LE: loop exit
PB: predicated region body
PF: predicated region fallthrough
CT: control target
= control target key end

     0   :  { %v2284_v3 = vmov 0.0   ;;  %s3052_s2 = inlined_call_operand.vmem [shape: f32[128,512], index: 2, kind: input, shape index: {}]   ;;  %s3053_s3 = inlined_call_operand.vmem [shape: f32[8,128], index: 3, kind: input, shape index: {}]   ;;  %s3054_s1 = inlined_call_operand.vmem [shape: f32[1,512], index: 1, kind: input, shape index: {}]   ;;  %s3055_s0 = inlined_call_operand.vmem [shape: f32[8,8,512], index: 0, kind: input, shape index: {}]   ;;  %s3056_s4 = inlined_call_operand.vmem [shape: f32[8,128], index: 4, kind: input, shape index: {}]   ;;  %s3057_s5 = inlined_call_operand.vmem [shape: f32[8,8,128], index: 5, kind: output, shape index: {0}]   ;;  %s3058_s7 = inlined_call_operand.vmem [shape: f32[8,128], index: 7, kind: output, shape index: {2}]   ;;  %s3059_s6 = inlined_call_operand.vmem [shape: f32[8,128], index: 6, kind: output, shape index: {1}]  }
   0x1   :  { %v32_v0 = vld [vmem:[%s3052_s2 + $0x8] sm:$0xff]  ;;  %v31_v2 = vld [vmem:[%s3052_s2] sm:$0xff]  ;;  %191 = vmatprep.mubr.f32.mxu0 %v2284_v3  ;;  %262 = vmatprep.mubr.f32.mxu1 %v2284_v3  ;;  %v34_v19 = vld [vmem:[%s3052_s2 + $0x18] sm:$0xff] }
   0x2   :  { %v36_v1 = vld [vmem:[%s3052_s2 + $0x28] sm:$0xff]  ;;  %v35_v5 = vld [vmem:[%s3052_s2 + $0x20] sm:$0xff]  ;;  %v38_v20 = vld [vmem:[%s3052_s2 + $0x38] sm:$0xff] }
   0x3   :  { %v2336_v4 = vpack.c.bf16 %v36_v1, %v32_v0  ;;  %v40_v6 = vld [vmem:[%s3052_s2 + $0x48] sm:$0xff]  ;;  %v2347_v8 = vpack.c.bf16 %v35_v5, %v31_v2  ;;  %v39_v10 = vld [vmem:[%s3052_s2 + $0x40] sm:$0xff]  ;;  %v2388_v22 = vpack.c.bf16 %v38_v20, %v34_v19  ;;  %v33_v23 = vld [vmem:[%s3052_s2 + $0x10] sm:$0xff] }
   0x4   :  { %v44_v7 = vld [vmem:[%s3052_s2 + $0x68] sm:$0xff]  ;;  %v43_v11 = vld [vmem:[%s3052_s2 + $0x60] sm:$0xff]  ;;  %v37_v24 = vld [vmem:[%s3052_s2 + $0x30] sm:$0xff] }
   0x5   :  { %v2349_v9 = vpack.c.bf16 %v44_v7, %v40_v6  ;;  %v48_v12 = vld [vmem:[%s3052_s2 + $0x88] sm:$0xff]  ;;  %1644 = vmatprep.subr.bf16.mxu0 %v2336_v4  ;;  %v2365_v14 = vpack.c.bf16 %v43_v11, %v39_v10  ;;  %v47_v15 = vld [vmem:[%s3052_s2 + $0x80] sm:$0xff]  ;;  %v2396_v25 = vpack.c.bf16 %v37_v24, %v33_v23  ;;  %1676 = vmatprep.subr.bf16.mxu1 %v2388_v22  ;;  %v42_v27 = vld [vmem:[%s3052_s2 + $0x58] sm:$0xff] }
   0x6   :  { %v52_v13 = vld [vmem:[%s3052_s2 + $0xa8] sm:$0xff]  ;;  %1646 = vmatpush1.bf16.msra.mxu0 %v2347_v8  ;;  %v51_v16 = vld [vmem:[%s3052_s2 + $0xa0] sm:$0xff]  ;;  %v46_v28 = vld [vmem:[%s3052_s2 + $0x78] sm:$0xff] }
   0x7   :  { %1648 = vmatprep.subr.bf16.mxu0 %v2349_v9  ;;  %v2374_v17 = vpack.c.bf16 %v52_v13, %v48_v12  ;;  %v56_v18 = vld [vmem:[%s3052_s2 + $0xc8] sm:$0xff]  ;;  %v2399_v26 = vpack.c.bf16 %v51_v16, %v47_v15  ;;  %v41_v29 = vld [vmem:[%s3052_s2 + $0x50] sm:$0xff]  ;;  %v55_v31 = vld [vmem:[%s3052_s2 + $0xc0] sm:$0xff]  ;;  %1678 = vmatpush1.bf16.msra.mxu1 %v2396_v25  ;;  %v2421_v33 = vpack.c.bf16 %v46_v28, %v42_v27 }
   0x8   :  { %v60_v21 = vld [vmem:[%s3052_s2 + $0xe8] sm:$0xff]  ;;  %v59_v32 = vld [vmem:[%s3052_s2 + $0xe0] sm:$0xff]  ;;  %v45_v34 = vld [vmem:[%s3052_s2 + $0x70] sm:$0xff] }
   0x9   :  { %v2412_v30 = vpack.c.bf16 %v60_v21, %v56_v18  ;;  %v64_v35 = vld [vmem:[%s3052_s2 + $0x108] sm:$0xff]  ;;  %v2432_v37 = vpack.c.bf16 %v45_v34, %v41_v29  ;;  %v50_v38 = vld [vmem:[%s3052_s2 + $0x98] sm:$0xff]  ;;  %1680 = vmatprep.subr.bf16.mxu1 %v2421_v33  ;;  %v49_v40 = vld [vmem:[%s3052_s2 + $0x90] sm:$0xff]  ;;  %v2448_v42 = vpack.c.bf16 %v59_v32, %v55_v31 }
   0xa   :  { %1650 = vmatpush1.bf16.msra.mxu0 %v2365_v14  ;;  %v68_v36 = vld [vmem:[%s3052_s2 + $0x128] sm:$0xff]  ;;  %v54_v39 = vld [vmem:[%s3052_s2 + $0xb8] sm:$0xff]  ;;  %v53_v41 = vld [vmem:[%s3052_s2 + $0xb0] sm:$0xff] }
   0xb   :  { %1652 = vmatprep.subr.bf16.mxu0 %v2374_v17  ;;  %v63_v43 = vld [vmem:[%s3052_s2 + $0x100] sm:$0xff]  ;;  %v2456_v45 = vpack.c.bf16 %v54_v39, %v50_v38  ;;  %v2459_v46 = vpack.c.bf16 %v68_v36, %v64_v35  ;;  %1682 = vmatpush1.bf16.msra.mxu1 %v2432_v37  ;;  %v72_v47 = vld [vmem:[%s3052_s2 + $0x148] sm:$0xff]  ;;  %v2465_v48 = vpack.c.bf16 %v53_v41, %v49_v40  ;;  %v58_v49 = vld [vmem:[%s3052_s2 + $0xd8] sm:$0xff] }
   0xc   :  { %v67_v44 = vld [vmem:[%s3052_s2 + $0x120] sm:$0xff]  ;;  %v62_v50 = vld [vmem:[%s3052_s2 + $0xf8] sm:$0xff]  ;;  %v76_v51 = vld [vmem:[%s3052_s2 + $0x168] sm:$0xff] }
   0xd   :  { %1684 = vmatprep.subr.bf16.mxu1 %v2456_v45  ;;  %v2477_v52 = vpack.c.bf16 %v62_v50, %v58_v49  ;;  %v57_v53 = vld [vmem:[%s3052_s2 + $0xd0] sm:$0xff]  ;;  %v2486_v55 = vpack.c.bf16 %v67_v44, %v63_v43  ;;  %v66_v56 = vld [vmem:[%s3052_s2 + $0x118] sm:$0xff]  ;;  %v2495_v58 = vpack.c.bf16 %v76_v51, %v72_v47  ;;  %v71_v59 = vld [vmem:[%s3052_s2 + $0x140] sm:$0xff]  ;;  %v103_v50 = vlaneseq }
   0xe   :  { %1654 = vmatpush1.bf16.msra.mxu0 %v2399_v26  ;;  %v61_v54 = vld [vmem:[%s3052_s2 + $0xf0] sm:$0xff]  ;;  %v70_v57 = vld [vmem:[%s3052_s2 + $0x138] sm:$0xff]  ;;  %v75_v60 = vld [vmem:[%s3052_s2 + $0x160] sm:$0xff] }
   0xf   :  { %1656 = vmatprep.subr.bf16.mxu0 %v2412_v30  ;;  %1686 = vmatpush1.bf16.msra.mxu1 %v2465_v48  ;;  %v80_v61 = vld [vmem:[%s3052_s2 + $0x188] sm:$0xff]  ;;  %v2507_v62 = vpack.c.bf16 %v61_v54, %v57_v53  ;;  %v2513_v0 = vpack.c.bf16 %v70_v57, %v66_v56  ;;  %v65_v1 = vld [vmem:[%s3052_s2 + $0x110] sm:$0xff]  ;;  %v74_v5 = vld [vmem:[%s3052_s2 + $0x158] sm:$0xff]  ;;  %v2528_v7 = vpack.c.bf16 %v75_v60, %v71_v59  ;;  %v104_v51 = vshrl.u32 %v103_v50, 7 }
  0x10   :  { %v84_v63 = vld [vmem:[%s3052_s2 + $0x1a8] sm:$0xff]  ;;  %1688 = vmatprep.subr.bf16.mxu1 %v2477_v52  ;;  %v69_v2 = vld [vmem:[%s3052_s2 + $0x130] sm:$0xff]  ;;  %v78_v6 = vld [vmem:[%s3052_s2 + $0x178] sm:$0xff] }
  0x11   :  { %v2531_v10 = vpack.c.bf16 %v84_v63, %v80_v61  ;;  %v79_v11 = vld [vmem:[%s3052_s2 + $0x180] sm:$0xff]  ;;  %v88_v13 = vld [vmem:[%s3052_s2 + $0x1c8] sm:$0xff]  ;;  %v2543_v15 = vpack.c.bf16 %v69_v2, %v65_v1  ;;  %v2549_v18 = vpack.c.bf16 %v78_v6, %v74_v5  ;;  %v73_v19 = vld [vmem:[%s3052_s2 + $0x150] sm:$0xff]  ;;  %v105_v53 = vsub.s32 0, %v104_v51 }
  0x12   :  { %1658 = vmatpush1.bf16.msra.mxu0 %v2448_v42  ;;  %v83_v12 = vld [vmem:[%s3052_s2 + $0x1a0] sm:$0xff]  ;;  %v92_v16 = vld [vmem:[%s3052_s2 + $0x1e8] sm:$0xff]  ;;  %v77_v20 = vld [vmem:[%s3052_s2 + $0x170] sm:$0xff]  ;;  %v109_v56 = vsub.s32 1, %v104_v51  ;;  %v117_v63 = vsub.s32 3, %v104_v51 }
  0x13   :  { %1660 = vmatprep.subr.bf16.mxu0 %v2459_v46  ;;  %1690 = vmatpush1.bf16.msra.mxu1 %v2507_v62  ;;  %v82_v21 = vld [vmem:[%s3052_s2 + $0x198] sm:$0xff]  ;;  %v2564_v24 = vpack.c.bf16 %v83_v12, %v79_v11  ;;  %v2567_v27 = vpack.c.bf16 %v92_v16, %v88_v13  ;;  %v87_v28 = vld [vmem:[%s3052_s2 + $0x1c0] sm:$0xff]  ;;  %v2576_v31 = vpack.c.bf16 %v77_v20, %v73_v19  ;;  %v81_v34 = vld [vmem:[%s3052_s2 + $0x190] sm:$0xff]  ;;  %v113_v11 = vsub.s32 2, %v104_v51 }
  0x14   :  { %1692 = vmatprep.subr.bf16.mxu1 %v2513_v0  ;;  %v86_v23 = vld [vmem:[%s3052_s2 + $0x1b8] sm:$0xff]  ;;  %v91_v29 = vld [vmem:[%s3052_s2 + $0x1e0] sm:$0xff]  ;;  %v85_v35 = vld [vmem:[%s3052_s2 + $0x1b0] sm:$0xff] }
  0x15   :  { %v2579_v32 = vpack.c.bf16 %v86_v23, %v82_v21  ;;  %v90_v36 = vld [vmem:[%s3052_s2 + $0x1d8] sm:$0xff]  ;;  %v2594_v39 = vpack.c.bf16 %v91_v29, %v87_v28  ;;  %v2598_v40 = vpack.c.bf16 %v85_v35, %v81_v34  ;;  %v89_v43 = vld [vmem:[%s3052_s2 + $0x1d0] sm:$0xff]  ;;  %v27_v47 = vld [vmem:[%s3053_s3] sm:$0xff] }
  0x16   :  { %1662 = vmatpush1.bf16.msra.mxu0 %v2486_v55  ;;  %v94_v38 = vld [vmem:[%s3052_s2 + $0x1f8] sm:$0xff]  ;;  %v93_v44 = vld [vmem:[%s3052_s2 + $0x1f0] sm:$0xff]  ;;  %v95_v54 = vld [vmem:[%s3054_s1] sm:$0xf] }
  0x17   :  { %1664 = vmatprep.subr.bf16.mxu0 %v2495_v58  ;;  %1694 = vmatpush1.bf16.msra.mxu1 %v2543_v15  ;;  %v2601_v41 = vpack.c.bf16 %v94_v38, %v90_v36  ;;  %v2614_v49 = vpack.c.bf16 %v93_v44, %v89_v43  ;;  %v2657_v57 = vrot.slane %v95_v54, %v105_v53  ;;  %v98_v59 = vld [vmem:[%s3055_s0] sm:$0xff]  ;;  %v99_v61 = vld [vmem:[%s3055_s0 + $0x8] sm:$0xff]  ;;  %v101_v12 = vld [vmem:[%s3055_s0 + $0x18] sm:$0xff] }
  0x18   :  { %1696 = vmatprep.subr.bf16.mxu1 %v2549_v18  ;;  %v2662_v60 = vrot.slane %v95_v54, %v109_v56  ;;  %v2669_v5 = vrot.slane %v95_v54, %v117_v63  ;;  %v2675_v28 = vrot.slane %v95_v54, %v113_v11  ;;  %v100_v29 = vld [vmem:[%s3055_s0 + $0x10] sm:$0xff] }
  0x19   :  { %v123_v1 = vadd.f32 %v2657_v57, %v98_v59  ;;  %v29_v59 = vld [vmem:[%s3056_s4] sm:$0xff] }
  0x1a   :  { %1666 = vmatpush1.bf16.msra.mxu0 %v2528_v7  ;;  %v124_v2 = vadd.f32 %v2662_v60, %v99_v61  ;;  %v126_v21 = vadd.f32 %v2669_v5, %v101_v12  ;;  %v125_v38 = vadd.f32 %v2675_v28, %v100_v29 }
  0x1b   :  { %1668 = vmatprep.subr.bf16.mxu0 %v2531_v10  ;;  %1698 = vmatpush1.bf16.msra.mxu1 %v2576_v31 }
  0x1c   :  { %1700 = vmatprep.subr.bf16.mxu1 %v2579_v32 }
  0x1e   :  { %1670 = vmatpush1.bf16.msra.mxu0 %v2564_v24 }
  0x1f   :  { %1672 = vmatprep.subr.bf16.mxu0 %v2567_v27  ;;  %1702 = vmatpush1.bf16.msra.mxu1 %v2598_v40 }
  0x20   :  { %1704 = vmatprep.subr.bf16.mxu1 %v2601_v41 }
  0x22   :  { %1674 = vmatpush1.bf16.msra.mxu0 %v2594_v39 }
  0x23   :  { %1708 = vmatprep.subr.bf16.mxu0 %v2336_v4  ;;  %1706 = vmatpush1.bf16.msra.mxu1 %v2614_v49 }
  0x24   :  { %1740 = vmatprep.subr.bf16.mxu1 %v2388_v22 }
  0x25   :  { %192 = vmatmul.mubr.f32.vlgmr.msra.gmra.mrb[0].mxu0 %v27_v47 }
  0x26   :  { %1710 = vmatpush1.bf16.msra.mxu0 %v2347_v8  ;;  %371 = vmatprep.mubr.f32.mxu0 %v2284_v3 }
  0x27   :  { %1712 = vmatprep.subr.bf16.mxu0 %v2349_v9  ;;  %263 = vmatmul.mubr.f32.vlgmr.msra.gmra.mrb[0].mxu1 %v27_v47 }
  0x28   :  { %1742 = vmatpush1.bf16.msra.mxu1 %v2396_v25  ;;  %442 = vmatprep.mubr.f32.mxu1 %v2284_v3 }
  0x29   :  { %1744 = vmatprep.subr.bf16.mxu1 %v2421_v33 }
  0x2a   :  { %1714 = vmatpush1.bf16.msra.mxu0 %v2365_v14 }
  0x2b   :  { %1716 = vmatprep.subr.bf16.mxu0 %v2374_v17 }
  0x2c   :  { %1746 = vmatpush1.bf16.msra.mxu1 %v2432_v37 }
  0x2d   :  { %1748 = vmatprep.subr.bf16.mxu1 %v2456_v45 }
  0x2e   :  { %1718 = vmatpush1.bf16.msra.mxu0 %v2399_v26 }
  0x2f   :  { %1720 = vmatprep.subr.bf16.mxu0 %v2412_v30 }
  0x30   :  { %1750 = vmatpush1.bf16.msra.mxu1 %v2465_v48 }
  0x31   :  { %1752 = vmatprep.subr.bf16.mxu1 %v2477_v52 }
  0x32   :  { %1722 = vmatpush1.bf16.msra.mxu0 %v2448_v42 }
  0x33   :  { %1724 = vmatprep.subr.bf16.mxu0 %v2459_v46 }
  0x34   :  { %1754 = vmatpush1.bf16.msra.mxu1 %v2507_v62 }
  0x35   :  { %1756 = vmatprep.subr.bf16.mxu1 %v2513_v0 }
  0x36   :  { %1726 = vmatpush1.bf16.msra.mxu0 %v2486_v55 }
  0x37   :  { %1728 = vmatprep.subr.bf16.mxu0 %v2495_v58 }
  0x38   :  { %1758 = vmatpush1.bf16.msra.mxu1 %v2543_v15 }
  0x39   :  { %1760 = vmatprep.subr.bf16.mxu1 %v2549_v18 }
  0x3a   :  { %1730 = vmatpush1.bf16.msra.mxu0 %v2528_v7 }
  0x3b   :  { %1732 = vmatprep.subr.bf16.mxu0 %v2531_v10 }
  0x3c   :  { %1762 = vmatpush1.bf16.msra.mxu1 %v2576_v31 }
  0x3d   :  { %1764 = vmatprep.subr.bf16.mxu1 %v2579_v32 }
  0x3e   :  { %1734 = vmatpush1.bf16.msra.mxu0 %v2564_v24 }
  0x3f   :  { %1736 = vmatprep.subr.bf16.mxu0 %v2567_v27 }
  0x40   :  { %1766 = vmatpush1.bf16.msra.mxu1 %v2598_v40 }
  0x41   :  { %1768 = vmatprep.subr.bf16.mxu1 %v2601_v41 }
  0x42   :  { %1738 = vmatpush1.bf16.msra.mxu0 %v2594_v39 }
  0x43   :  { %1772 = vmatprep.subr.bf16.mxu0 %v2336_v4 }
  0x44   :  { %1770 = vmatpush1.bf16.msra.mxu1 %v2614_v49 }
  0x45   :  { %1804 = vmatprep.subr.bf16.mxu1 %v2388_v22 }
  0xf8   :  { %v193_v6 = vpop.f32.mrb[0].mxu0 }
  0xf9   :  { %v269_v13 = vadd.f32 %v193_v6, %v123_v1  ;;  %v195_v16 = vpop.f32.mrb[1].mxu0 }
  0xfa   :  { %v270_v19 = vadd.f32 %v195_v16, %v124_v2  ;;  %v264_v34 = vpop.f32.mrb[0].mxu1 }
  0xfb   :  { %v1584_v20 = vmul.f32 -1.442695, %v269_v13  ;;  %v266_v35 = vpop.f32.mrb[1].mxu1  ;;  %v271_v44 = vadd.f32 %v264_v34, %v125_v38  ;;  %v1590_v38 = vld [vmem:[%s3055_s0 + $0x38] sm:$0xff] }
  0xfc   :  { %v1585_v23 = vmul.f32 -1.442695, %v270_v19  ;;  %v272_v36 = vadd.f32 %v266_v35, %v126_v21  ;;  %v1587_v19 = vld [vmem:[%s3055_s0 + $0x20] sm:$0xff] }
  0xfd   :  { %2156 = vpow2.f32 %v1584_v20  ;;  %v1588_v20 = vld [vmem:[%s3055_s0 + $0x28] sm:$0xff]  ;;  %v303_v21 = vadd.f32 %v1587_v19, %v2657_v57 }
  0xfe   :  { %2158 = vpow2.f32 %v1585_v23  ;;  %v1586_v43 = vmul.f32 -1.442695, %v272_v36  ;;  %v304_v23 = vadd.f32 %v1588_v20, %v2662_v60 }
 0x100   :  { %2160 = vpow2.f32 %v1586_v43 }
 0x101   :  { %2162 = vtanh.f32 %v271_v44 }
 0x107   :  { %v2157_v47 = vpop.eup %2156 }
 0x108   :  { %v2159_v50 = vpop.eup %2158  ;;  %v276_v51 = vadd.f32 1.0, %v2157_v47 }
 0x109   :  { %v282_v53 = vadd.f32 1.0, %v2159_v50 }
 0x10a   :  { %2164 = vrcp.f32 %v276_v51  ;;  %v2161_v54 = vpop.eup %2160  ;;  %v306_v51 = vadd.f32 %v1590_v38, %v2669_v5  ;;  %v1596_v38 = vld [vmem:[%s3055_s0 + $0x48] sm:$0xff] }
 0x10b   :  { %2166 = vrcp.f32 %v282_v53  ;;  %v2163_v56 = vpop.eup %2162  ;;  %v289_v63 = vadd.f32 1.0, %v2161_v54  ;;  %v1589_v53 = vld [vmem:[%s3055_s0 + $0x30] sm:$0xff] }
 0x10d   :  { %2168 = vrcp.f32 %v289_v63 }
 0x114   :  { %v2165_v61 = vpop.eup %2164 }
 0x115   :  { %v2167_v1 = vpop.eup %2166  ;;  %v293_v2 = vmul.f32 %v2165_v61, %v2163_v56  ;;  %v305_v56 = vadd.f32 %v1589_v53, %v2675_v28 }
 0x116   :  { %v292_v6 = vmul.f32 %v2167_v1, %v29_v59 }
 0x117   :  { %v2169_v12 = vpop.eup %2168 }
 0x118   :  { %v2684_v11 = vadd.f32 %v293_v2, %v292_v6 }
 0x11a   :  { %2170 = vtanh.f32 %v2684_v11 }
 0x124   :  { %v2171_v13 = vpop.eup %2170 }
 0x125   :  { %v296_v16 = vmul.f32 %v2171_v13, %v2169_v12 }
 0x127   :  { %297 = vst [vmem:[%s3057_s5] sm:$0xff] %v296_v16  ;;  %372 = vmatmul.mubr.f32.vlgmr.msra.gmra.mrb[2].mxu0 %v296_v16  ;;  %443 = vmatmul.mubr.f32.vlgmr.msra.gmra.mrb[2].mxu1 %v296_v16 }
 0x128   :  { %1774 = vmatpush1.bf16.msra.mxu0 %v2347_v8  ;;  %1806 = vmatpush1.bf16.msra.mxu1 %v2396_v25 }
 0x129   :  { %1776 = vmatprep.subr.bf16.mxu0 %v2349_v9  ;;  %1808 = vmatprep.subr.bf16.mxu1 %v2421_v33 }
 0x12a   :  { %552 = vmatprep.mubr.f32.mxu0 %v2284_v3  ;;  %623 = vmatprep.mubr.f32.mxu1 %v2284_v3 }
 0x12c   :  { %1778 = vmatpush1.bf16.msra.mxu0 %v2365_v14  ;;  %1810 = vmatpush1.bf16.msra.mxu1 %v2432_v37 }
 0x12d   :  { %1780 = vmatprep.subr.bf16.mxu0 %v2374_v17  ;;  %1812 = vmatprep.subr.bf16.mxu1 %v2456_v45 }
 0x130   :  { %1782 = vmatpush1.bf16.msra.mxu0 %v2399_v26  ;;  %1814 = vmatpush1.bf16.msra.mxu1 %v2465_v48 }
 0x131   :  { %1784 = vmatprep.subr.bf16.mxu0 %v2412_v30  ;;  %1816 = vmatprep.subr.bf16.mxu1 %v2477_v52 }
 0x134   :  { %1786 = vmatpush1.bf16.msra.mxu0 %v2448_v42  ;;  %1818 = vmatpush1.bf16.msra.mxu1 %v2507_v62 }
 0x135   :  { %1788 = vmatprep.subr.bf16.mxu0 %v2459_v46  ;;  %1820 = vmatprep.subr.bf16.mxu1 %v2513_v0 }
 0x138   :  { %1790 = vmatpush1.bf16.msra.mxu0 %v2486_v55  ;;  %1822 = vmatpush1.bf16.msra.mxu1 %v2543_v15 }
 0x139   :  { %1792 = vmatprep.subr.bf16.mxu0 %v2495_v58  ;;  %1824 = vmatprep.subr.bf16.mxu1 %v2549_v18 }
 0x13c   :  { %1794 = vmatpush1.bf16.msra.mxu0 %v2528_v7  ;;  %1826 = vmatpush1.bf16.msra.mxu1 %v2576_v31 }
 0x13d   :  { %1796 = vmatprep.subr.bf16.mxu0 %v2531_v10  ;;  %1828 = vmatprep.subr.bf16.mxu1 %v2579_v32 }
 0x140   :  { %1798 = vmatpush1.bf16.msra.mxu0 %v2564_v24  ;;  %1830 = vmatpush1.bf16.msra.mxu1 %v2598_v40 }
 0x141   :  { %1800 = vmatprep.subr.bf16.mxu0 %v2567_v27  ;;  %1832 = vmatprep.subr.bf16.mxu1 %v2601_v41 }
 0x144   :  { %1802 = vmatpush1.bf16.msra.mxu0 %v2594_v39  ;;  %1834 = vmatpush1.bf16.msra.mxu1 %v2614_v49 }
 0x145   :  { %1836 = vmatprep.subr.bf16.mxu0 %v2336_v4  ;;  %1868 = vmatprep.subr.bf16.mxu1 %v2388_v22 }
 0x1fa   :  { %v373_v29 = vpop.f32.mrb[2].mxu0  ;;  %v444_v34 = vpop.f32.mrb[2].mxu1 }
 0x1fb   :  { %v449_v35 = vadd.f32 %v373_v29, %v303_v21  ;;  %v375_v36 = vpop.f32.mrb[3].mxu0  ;;  %v446_v43 = vpop.f32.mrb[3].mxu1  ;;  %v451_v61 = vadd.f32 %v444_v34, %v305_v56 }
 0x1fc   :  { %v450_v44 = vadd.f32 %v375_v36, %v304_v23  ;;  %v452_v54 = vadd.f32 %v446_v43, %v306_v51 }
 0x1fd   :  { %v1591_v47 = vmul.f32 -1.442695, %v449_v35 }
 0x1fe   :  { %v1592_v50 = vmul.f32 -1.442695, %v450_v44  ;;  %v1593_v59 = vmul.f32 -1.442695, %v452_v54  ;;  %v485_v44 = vadd.f32 %v1596_v38, %v2662_v60  ;;  %v1598_v54 = vld [vmem:[%s3055_s0 + $0x58] sm:$0xff] }
 0x1ff   :  { %2172 = vpow2.f32 %v1591_v47 }
 0x200   :  { %2174 = vpow2.f32 %v1592_v50 }
 0x201   :  { %2176 = vpow2.f32 %v1593_v59 }
 0x202   :  { %2178 = vtanh.f32 %v451_v61 }
 0x209   :  { %v2173_v63 = vpop.eup %2172 }
 0x20a   :  { %v2175_v1 = vpop.eup %2174  ;;  %v456_v2 = vadd.f32 1.0, %v2173_v63 }
 0x20b   :  { %v462_v6 = vadd.f32 1.0, %v2175_v1  ;;  %v2177_v12 = vpop.eup %2176  ;;  %v487_v1 = vadd.f32 %v1598_v54, %v2669_v5  ;;  %v1604_v54 = vld [vmem:[%s3055_s0 + $0x68] sm:$0xff] }
 0x20c   :  { %2180 = vrcp.f32 %v456_v2  ;;  %v2179_v13 = vpop.eup %2178  ;;  %v469_v21 = vadd.f32 1.0, %v2177_v12  ;;  %v1597_v2 = vld [vmem:[%s3055_s0 + $0x50] sm:$0xff] }
 0x20d   :  { %2182 = vrcp.f32 %v462_v6  ;;  %v486_v12 = vadd.f32 %v1597_v2, %v2675_v28 }
 0x20e   :  { %2184 = vrcp.f32 %v469_v21 }
 0x216   :  { %v2181_v16 = vpop.eup %2180 }
 0x217   :  { %v2183_v19 = vpop.eup %2182  ;;  %v473_v20 = vmul.f32 %v2181_v16, %v2179_v13 }
 0x218   :  { %v472_v23 = vmul.f32 %v2183_v19, %v2684_v11  ;;  %v2185_v34 = vpop.eup %2184  ;;  %v1595_v11 = vld [vmem:[%s3055_s0 + $0x40] sm:$0xff] }
 0x219   :  { %v484_v43 = vadd.f32 %v1595_v11, %v2657_v57 }
 0x21a   :  { %v2741_v29 = vadd.f32 %v473_v20, %v472_v23 }
 0x21c   :  { %2186 = vtanh.f32 %v2741_v29 }
 0x226   :  { %v2187_v35 = vpop.eup %2186 }
 0x227   :  { %v476_v36 = vmul.f32 %v2187_v35, %v2185_v34 }
 0x229   :  { %1594 = vst [vmem:[%s3057_s5 + $0x8] sm:$0xff] %v476_v36  ;;  %553 = vmatmul.mubr.f32.vlgmr.msra.gmra.mrb[4].mxu0 %v476_v36  ;;  %624 = vmatmul.mubr.f32.vlgmr.msra.gmra.mrb[4].mxu1 %v476_v36 }
 0x22a   :  { %1838 = vmatpush1.bf16.msra.mxu0 %v2347_v8  ;;  %1870 = vmatpush1.bf16.msra.mxu1 %v2396_v25 }
 0x22b   :  { %1840 = vmatprep.subr.bf16.mxu0 %v2349_v9  ;;  %1872 = vmatprep.subr.bf16.mxu1 %v2421_v33 }
 0x22c   :  { %733 = vmatprep.mubr.f32.mxu0 %v2284_v3  ;;  %804 = vmatprep.mubr.f32.mxu1 %v2284_v3 }
 0x22e   :  { %1842 = vmatpush1.bf16.msra.mxu0 %v2365_v14  ;;  %1874 = vmatpush1.bf16.msra.mxu1 %v2432_v37 }
 0x22f   :  { %1844 = vmatprep.subr.bf16.mxu0 %v2374_v17  ;;  %1876 = vmatprep.subr.bf16.mxu1 %v2456_v45 }
 0x232   :  { %1846 = vmatpush1.bf16.msra.mxu0 %v2399_v26  ;;  %1878 = vmatpush1.bf16.msra.mxu1 %v2465_v48 }
 0x233   :  { %1848 = vmatprep.subr.bf16.mxu0 %v2412_v30  ;;  %1880 = vmatprep.subr.bf16.mxu1 %v2477_v52 }
 0x236   :  { %1850 = vmatpush1.bf16.msra.mxu0 %v2448_v42  ;;  %1882 = vmatpush1.bf16.msra.mxu1 %v2507_v62 }
 0x237   :  { %1852 = vmatprep.subr.bf16.mxu0 %v2459_v46  ;;  %1884 = vmatprep.subr.bf16.mxu1 %v2513_v0 }
 0x23a   :  { %1854 = vmatpush1.bf16.msra.mxu0 %v2486_v55  ;;  %1886 = vmatpush1.bf16.msra.mxu1 %v2543_v15 }
 0x23b   :  { %1856 = vmatprep.subr.bf16.mxu0 %v2495_v58  ;;  %1888 = vmatprep.subr.bf16.mxu1 %v2549_v18 }
 0x23e   :  { %1858 = vmatpush1.bf16.msra.mxu0 %v2528_v7  ;;  %1890 = vmatpush1.bf16.msra.mxu1 %v2576_v31 }
 0x23f   :  { %1860 = vmatprep.subr.bf16.mxu0 %v2531_v10  ;;  %1892 = vmatprep.subr.bf16.mxu1 %v2579_v32 }
 0x242   :  { %1862 = vmatpush1.bf16.msra.mxu0 %v2564_v24  ;;  %1894 = vmatpush1.bf16.msra.mxu1 %v2598_v40 }
 0x243   :  { %1864 = vmatprep.subr.bf16.mxu0 %v2567_v27  ;;  %1896 = vmatprep.subr.bf16.mxu1 %v2601_v41 }
 0x246   :  { %1866 = vmatpush1.bf16.msra.mxu0 %v2594_v39  ;;  %1898 = vmatpush1.bf16.msra.mxu1 %v2614_v49 }
 0x247   :  { %1900 = vmatprep.subr.bf16.mxu0 %v2336_v4  ;;  %1932 = vmatprep.subr.bf16.mxu1 %v2388_v22 }
 0x2fc   :  { %v554_v47 = vpop.f32.mrb[4].mxu0  ;;  %v625_v50 = vpop.f32.mrb[4].mxu1 }
 0x2fd   :  { %v630_v51 = vadd.f32 %v554_v47, %v484_v43  ;;  %v556_v53 = vpop.f32.mrb[5].mxu0  ;;  %v627_v56 = vpop.f32.mrb[5].mxu1  ;;  %v632_v16 = vadd.f32 %v625_v50, %v486_v12 }
 0x2fe   :  { %v631_v59 = vadd.f32 %v556_v53, %v485_v44  ;;  %v633_v6 = vadd.f32 %v627_v56, %v487_v1 }
 0x2ff   :  { %v1599_v61 = vmul.f32 -1.442695, %v630_v51 }
 0x300   :  { %v1600_v63 = vmul.f32 -1.442695, %v631_v59  ;;  %v1601_v13 = vmul.f32 -1.442695, %v633_v6  ;;  %v666_v59 = vadd.f32 %v1604_v54, %v2662_v60  ;;  %v1606_v6 = vld [vmem:[%s3055_s0 + $0x78] sm:$0xff] }
 0x301   :  { %2188 = vpow2.f32 %v1599_v61 }
 0x302   :  { %2190 = vpow2.f32 %v1600_v63 }
 0x303   :  { %2192 = vpow2.f32 %v1601_v13 }
 0x304   :  { %2194 = vtanh.f32 %v632_v16 }
 0x30b   :  { %v2189_v19 = vpop.eup %2188 }
 0x30c   :  { %v2191_v20 = vpop.eup %2190  ;;  %v637_v21 = vadd.f32 1.0, %v2189_v19 }
 0x30d   :  { %v643_v23 = vadd.f32 1.0, %v2191_v20  ;;  %v2193_v34 = vpop.eup %2192  ;;  %v668_v20 = vadd.f32 %v1606_v6, %v2669_v5  ;;  %v1612_v6 = vld [vmem:[%s3055_s0 + $0x88] sm:$0xff] }
 0x30e   :  { %2196 = vrcp.f32 %v637_v21  ;;  %v2195_v35 = vpop.eup %2194  ;;  %v650_v43 = vadd.f32 1.0, %v2193_v34  ;;  %v1605_v21 = vld [vmem:[%s3055_s0 + $0x70] sm:$0xff] }
 0x30f   :  { %2198 = vrcp.f32 %v643_v23  ;;  %v667_v34 = vadd.f32 %v1605_v21, %v2675_v28 }
 0x310   :  { %2200 = vrcp.f32 %v650_v43 }
 0x318   :  { %v2197_v36 = vpop.eup %2196 }
 0x319   :  { %v2199_v11 = vpop.eup %2198  ;;  %v654_v38 = vmul.f32 %v2197_v36, %v2195_v35 }
 0x31a   :  { %v653_v44 = vmul.f32 %v2199_v11, %v2741_v29  ;;  %v2201_v50 = vpop.eup %2200  ;;  %v1603_v29 = vld [vmem:[%s3055_s0 + $0x60] sm:$0xff] }
 0x31b   :  { %v665_v56 = vadd.f32 %v1603_v29, %v2657_v57 }
 0x31c   :  { %v2798_v47 = vadd.f32 %v654_v38, %v653_v44 }
 0x31e   :  { %2202 = vtanh.f32 %v2798_v47 }
 0x328   :  { %v2203_v51 = vpop.eup %2202 }
 0x329   :  { %v657_v53 = vmul.f32 %v2203_v51, %v2201_v50 }
 0x32b   :  { %1602 = vst [vmem:[%s3057_s5 + $0x10] sm:$0xff] %v657_v53  ;;  %734 = vmatmul.mubr.f32.vlgmr.msra.gmra.mrb[6].mxu0 %v657_v53  ;;  %805 = vmatmul.mubr.f32.vlgmr.msra.gmra.mrb[6].mxu1 %v657_v53 }
 0x32c   :  { %1902 = vmatpush1.bf16.msra.mxu0 %v2347_v8  ;;  %1934 = vmatpush1.bf16.msra.mxu1 %v2396_v25 }
 0x32d   :  { %1904 = vmatprep.subr.bf16.mxu0 %v2349_v9  ;;  %1936 = vmatprep.subr.bf16.mxu1 %v2421_v33 }
 0x32e   :  { %914 = vmatprep.mubr.f32.mxu0 %v2284_v3  ;;  %985 = vmatprep.mubr.f32.mxu1 %v2284_v3 }
 0x330   :  { %1906 = vmatpush1.bf16.msra.mxu0 %v2365_v14  ;;  %1938 = vmatpush1.bf16.msra.mxu1 %v2432_v37 }
 0x331   :  { %1908 = vmatprep.subr.bf16.mxu0 %v2374_v17  ;;  %1940 = vmatprep.subr.bf16.mxu1 %v2456_v45 }
 0x334   :  { %1910 = vmatpush1.bf16.msra.mxu0 %v2399_v26  ;;  %1942 = vmatpush1.bf16.msra.mxu1 %v2465_v48 }
 0x335   :  { %1912 = vmatprep.subr.bf16.mxu0 %v2412_v30  ;;  %1944 = vmatprep.subr.bf16.mxu1 %v2477_v52 }
 0x338   :  { %1914 = vmatpush1.bf16.msra.mxu0 %v2448_v42  ;;  %1946 = vmatpush1.bf16.msra.mxu1 %v2507_v62 }
 0x339   :  { %1916 = vmatprep.subr.bf16.mxu0 %v2459_v46  ;;  %1948 = vmatprep.subr.bf16.mxu1 %v2513_v0 }
 0x33c   :  { %1918 = vmatpush1.bf16.msra.mxu0 %v2486_v55  ;;  %1950 = vmatpush1.bf16.msra.mxu1 %v2543_v15 }
 0x33d   :  { %1920 = vmatprep.subr.bf16.mxu0 %v2495_v58  ;;  %1952 = vmatprep.subr.bf16.mxu1 %v2549_v18 }
 0x340   :  { %1922 = vmatpush1.bf16.msra.mxu0 %v2528_v7  ;;  %1954 = vmatpush1.bf16.msra.mxu1 %v2576_v31 }
 0x341   :  { %1924 = vmatprep.subr.bf16.mxu0 %v2531_v10  ;;  %1956 = vmatprep.subr.bf16.mxu1 %v2579_v32 }
 0x344   :  { %1926 = vmatpush1.bf16.msra.mxu0 %v2564_v24  ;;  %1958 = vmatpush1.bf16.msra.mxu1 %v2598_v40 }
 0x345   :  { %1928 = vmatprep.subr.bf16.mxu0 %v2567_v27  ;;  %1960 = vmatprep.subr.bf16.mxu1 %v2601_v41 }
 0x348   :  { %1930 = vmatpush1.bf16.msra.mxu0 %v2594_v39  ;;  %1962 = vmatpush1.bf16.msra.mxu1 %v2614_v49 }
 0x349   :  { %1964 = vmatprep.subr.bf16.mxu0 %v2336_v4  ;;  %1996 = vmatprep.subr.bf16.mxu1 %v2388_v22 }
 0x3fe   :  { %v735_v61 = vpop.f32.mrb[6].mxu0  ;;  %v806_v63 = vpop.f32.mrb[6].mxu1 }
 0x3ff   :  { %v811_v1 = vadd.f32 %v735_v61, %v665_v56  ;;  %v737_v2 = vpop.f32.mrb[7].mxu0  ;;  %v808_v12 = vpop.f32.mrb[7].mxu1  ;;  %v813_v36 = vadd.f32 %v806_v63, %v667_v34 }
 0x400   :  { %v812_v13 = vadd.f32 %v737_v2, %v666_v59  ;;  %v814_v23 = vadd.f32 %v808_v12, %v668_v20 }
 0x401   :  { %v1607_v16 = vmul.f32 -1.442695, %v811_v1 }
 0x402   :  { %v1608_v19 = vmul.f32 -1.442695, %v812_v13  ;;  %v1609_v35 = vmul.f32 -1.442695, %v814_v23  ;;  %v847_v13 = vadd.f32 %v1612_v6, %v2662_v60  ;;  %v1614_v23 = vld [vmem:[%s3055_s0 + $0x98] sm:$0xff] }
 0x403   :  { %2204 = vpow2.f32 %v1607_v16 }
 0x404   :  { %2206 = vpow2.f32 %v1608_v19 }
 0x405   :  { %2208 = vpow2.f32 %v1609_v35 }
 0x406   :  { %2210 = vtanh.f32 %v813_v36 }
 0x40d   :  { %v2205_v11 = vpop.eup %2204 }
 0x40e   :  { %v2207_v38 = vpop.eup %2206  ;;  %v818_v43 = vadd.f32 1.0, %v2205_v11 }
 0x40f   :  { %v824_v44 = vadd.f32 1.0, %v2207_v38  ;;  %v2209_v50 = vpop.eup %2208  ;;  %v849_v38 = vadd.f32 %v1614_v23, %v2669_v5  ;;  %v1620_v23 = vld [vmem:[%s3055_s0 + $0xa8] sm:$0xff] }
 0x410   :  { %2212 = vrcp.f32 %v818_v43  ;;  %v2211_v51 = vpop.eup %2210  ;;  %v831_v56 = vadd.f32 1.0, %v2209_v50  ;;  %v1613_v43 = vld [vmem:[%s3055_s0 + $0x90] sm:$0xff] }
 0x411   :  { %2214 = vrcp.f32 %v824_v44  ;;  %v848_v50 = vadd.f32 %v1613_v43, %v2675_v28 }
 0x412   :  { %2216 = vrcp.f32 %v831_v56 }
 0x41a   :  { %v2213_v53 = vpop.eup %2212 }
 0x41b   :  { %v2215_v29 = vpop.eup %2214  ;;  %v835_v54 = vmul.f32 %v2213_v53, %v2211_v51 }
 0x41c   :  { %v834_v59 = vmul.f32 %v2215_v29, %v2798_v47  ;;  %v2217_v63 = vpop.eup %2216  ;;  %v1611_v47 = vld [vmem:[%s3055_s0 + $0x80] sm:$0xff] }
 0x41d   :  { %v846_v12 = vadd.f32 %v1611_v47, %v2657_v57 }
 0x41e   :  { %v2855_v61 = vadd.f32 %v835_v54, %v834_v59 }
 0x420   :  { %2218 = vtanh.f32 %v2855_v61 }
 0x42a   :  { %v2219_v1 = vpop.eup %2218 }
 0x42b   :  { %v838_v2 = vmul.f32 %v2219_v1, %v2217_v63 }
 0x42d   :  { %1610 = vst [vmem:[%s3057_s5 + $0x18] sm:$0xff] %v838_v2  ;;  %915 = vmatmul.mubr.f32.vlgmr.msra.gmra.mrb[8].mxu0 %v838_v2  ;;  %986 = vmatmul.mubr.f32.vlgmr.msra.gmra.mrb[8].mxu1 %v838_v2 }
 0x42e   :  { %1966 = vmatpush1.bf16.msra.mxu0 %v2347_v8  ;;  %1998 = vmatpush1.bf16.msra.mxu1 %v2396_v25 }
 0x42f   :  { %1968 = vmatprep.subr.bf16.mxu0 %v2349_v9  ;;  %2000 = vmatprep.subr.bf16.mxu1 %v2421_v33 }
 0x430   :  { %1095 = vmatprep.mubr.f32.mxu0 %v2284_v3  ;;  %1166 = vmatprep.mubr.f32.mxu1 %v2284_v3 }
 0x432   :  { %1970 = vmatpush1.bf16.msra.mxu0 %v2365_v14  ;;  %2002 = vmatpush1.bf16.msra.mxu1 %v2432_v37 }
 0x433   :  { %1972 = vmatprep.subr.bf16.mxu0 %v2374_v17  ;;  %2004 = vmatprep.subr.bf16.mxu1 %v2456_v45 }
 0x436   :  { %1974 = vmatpush1.bf16.msra.mxu0 %v2399_v26  ;;  %2006 = vmatpush1.bf16.msra.mxu1 %v2465_v48 }
 0x437   :  { %1976 = vmatprep.subr.bf16.mxu0 %v2412_v30  ;;  %2008 = vmatprep.subr.bf16.mxu1 %v2477_v52 }
 0x43a   :  { %1978 = vmatpush1.bf16.msra.mxu0 %v2448_v42  ;;  %2010 = vmatpush1.bf16.msra.mxu1 %v2507_v62 }
 0x43b   :  { %1980 = vmatprep.subr.bf16.mxu0 %v2459_v46  ;;  %2012 = vmatprep.subr.bf16.mxu1 %v2513_v0 }
 0x43e   :  { %1982 = vmatpush1.bf16.msra.mxu0 %v2486_v55  ;;  %2014 = vmatpush1.bf16.msra.mxu1 %v2543_v15 }
 0x43f   :  { %1984 = vmatprep.subr.bf16.mxu0 %v2495_v58  ;;  %2016 = vmatprep.subr.bf16.mxu1 %v2549_v18 }
 0x442   :  { %1986 = vmatpush1.bf16.msra.mxu0 %v2528_v7  ;;  %2018 = vmatpush1.bf16.msra.mxu1 %v2576_v31 }
 0x443   :  { %1988 = vmatprep.subr.bf16.mxu0 %v2531_v10  ;;  %2020 = vmatprep.subr.bf16.mxu1 %v2579_v32 }
 0x446   :  { %1990 = vmatpush1.bf16.msra.mxu0 %v2564_v24  ;;  %2022 = vmatpush1.bf16.msra.mxu1 %v2598_v40 }
 0x447   :  { %1992 = vmatprep.subr.bf16.mxu0 %v2567_v27  ;;  %2024 = vmatprep.subr.bf16.mxu1 %v2601_v41 }
 0x44a   :  { %1994 = vmatpush1.bf16.msra.mxu0 %v2594_v39  ;;  %2026 = vmatpush1.bf16.msra.mxu1 %v2614_v49 }
 0x44b   :  { %2028 = vmatprep.subr.bf16.mxu0 %v2336_v4  ;;  %2060 = vmatprep.subr.bf16.mxu1 %v2388_v22 }
 0x500   :  { %v916_v16 = vpop.f32.mrb[8].mxu0  ;;  %v987_v19 = vpop.f32.mrb[8].mxu1 }
 0x501   :  { %v992_v20 = vadd.f32 %v916_v16, %v846_v12  ;;  %v918_v21 = vpop.f32.mrb[9].mxu0  ;;  %v989_v34 = vpop.f32.mrb[9].mxu1  ;;  %v994_v53 = vadd.f32 %v987_v19, %v848_v50 }
 0x502   :  { %v993_v35 = vadd.f32 %v918_v21, %v847_v13  ;;  %v995_v44 = vadd.f32 %v989_v34, %v849_v38 }
 0x503   :  { %v1615_v36 = vmul.f32 -1.442695, %v992_v20 }
 0x504   :  { %v1616_v11 = vmul.f32 -1.442695, %v993_v35  ;;  %v1617_v51 = vmul.f32 -1.442695, %v995_v44  ;;  %v1028_v35 = vadd.f32 %v1620_v23, %v2662_v60 }
 0x505   :  { %2220 = vpow2.f32 %v1615_v36 }
 0x506   :  { %2222 = vpow2.f32 %v1616_v11 }
 0x507   :  { %2224 = vpow2.f32 %v1617_v51 }
 0x508   :  { %2226 = vtanh.f32 %v994_v53 }
 0x50f   :  { %v2221_v29 = vpop.eup %2220 }
 0x510   :  { %v2223_v54 = vpop.eup %2222  ;;  %v999_v56 = vadd.f32 1.0, %v2221_v29  ;;  %v1621_v29 = vld [vmem:[%s3055_s0 + $0xb0] sm:$0xff] }
 0x511   :  { %v1005_v59 = vadd.f32 1.0, %v2223_v54  ;;  %v2225_v63 = vpop.eup %2224 }
 0x512   :  { %2228 = vrcp.f32 %v999_v56  ;;  %v2227_v1 = vpop.eup %2226  ;;  %v1012_v12 = vadd.f32 1.0, %v2225_v63  ;;  %v1029_v56 = vadd.f32 %v1621_v29, %v2675_v28 }
 0x513   :  { %2230 = vrcp.f32 %v1005_v59 }
 0x514   :  { %2232 = vrcp.f32 %v1012_v12 }
 0x51c   :  { %v2229_v2 = vpop.eup %2228 }
 0x51d   :  { %v2231_v47 = vpop.eup %2230  ;;  %v1016_v6 = vmul.f32 %v2229_v2, %v2227_v1 }
 0x51e   :  { %v1015_v13 = vmul.f32 %v2231_v47, %v2855_v61  ;;  %v2233_v19 = vpop.eup %2232  ;;  %v1619_v61 = vld [vmem:[%s3055_s0 + $0xa0] sm:$0xff] }
 0x51f   :  { %v1027_v34 = vadd.f32 %v1619_v61, %v2657_v57 }
 0x520   :  { %v2912_v16 = vadd.f32 %v1016_v6, %v1015_v13 }
 0x522   :  { %2234 = vtanh.f32 %v2912_v16 }
 0x52c   :  { %v2235_v20 = vpop.eup %2234 }
 0x52d   :  { %v1019_v21 = vmul.f32 %v2235_v20, %v2233_v19 }
 0x52f   :  { %1618 = vst [vmem:[%s3057_s5 + $0x20] sm:$0xff] %v1019_v21  ;;  %1096 = vmatmul.mubr.f32.vlgmr.msra.gmra.mrb[10].mxu0 %v1019_v21  ;;  %1167 = vmatmul.mubr.f32.vlgmr.msra.gmra.mrb[10].mxu1 %v1019_v21 }
 0x530   :  { %2030 = vmatpush1.bf16.msra.mxu0 %v2347_v8  ;;  %2062 = vmatpush1.bf16.msra.mxu1 %v2396_v25 }
 0x531   :  { %2032 = vmatprep.subr.bf16.mxu0 %v2349_v9  ;;  %2064 = vmatprep.subr.bf16.mxu1 %v2421_v33 }
 0x532   :  { %1276 = vmatprep.mubr.f32.mxu0 %v2284_v3  ;;  %1347 = vmatprep.mubr.f32.mxu1 %v2284_v3 }
 0x534   :  { %2034 = vmatpush1.bf16.msra.mxu0 %v2365_v14  ;;  %2066 = vmatpush1.bf16.msra.mxu1 %v2432_v37 }
 0x535   :  { %2036 = vmatprep.subr.bf16.mxu0 %v2374_v17  ;;  %2068 = vmatprep.subr.bf16.mxu1 %v2456_v45 }
 0x538   :  { %2038 = vmatpush1.bf16.msra.mxu0 %v2399_v26  ;;  %2070 = vmatpush1.bf16.msra.mxu1 %v2465_v48 }
 0x539   :  { %2040 = vmatprep.subr.bf16.mxu0 %v2412_v30  ;;  %2072 = vmatprep.subr.bf16.mxu1 %v2477_v52 }
 0x53c   :  { %2042 = vmatpush1.bf16.msra.mxu0 %v2448_v42  ;;  %2074 = vmatpush1.bf16.msra.mxu1 %v2507_v62 }
 0x53d   :  { %2044 = vmatprep.subr.bf16.mxu0 %v2459_v46  ;;  %2076 = vmatprep.subr.bf16.mxu1 %v2513_v0 }
 0x540   :  { %2046 = vmatpush1.bf16.msra.mxu0 %v2486_v55  ;;  %2078 = vmatpush1.bf16.msra.mxu1 %v2543_v15 }
 0x541   :  { %2048 = vmatprep.subr.bf16.mxu0 %v2495_v58  ;;  %2080 = vmatprep.subr.bf16.mxu1 %v2549_v18 }
 0x544   :  { %2050 = vmatpush1.bf16.msra.mxu0 %v2528_v7  ;;  %2082 = vmatpush1.bf16.msra.mxu1 %v2576_v31 }
 0x545   :  { %2052 = vmatprep.subr.bf16.mxu0 %v2531_v10  ;;  %2084 = vmatprep.subr.bf16.mxu1 %v2579_v32 }
 0x548   :  { %2054 = vmatpush1.bf16.msra.mxu0 %v2564_v24  ;;  %2086 = vmatpush1.bf16.msra.mxu1 %v2598_v40 }
 0x549   :  { %2056 = vmatprep.subr.bf16.mxu0 %v2567_v27  ;;  %2088 = vmatprep.subr.bf16.mxu1 %v2601_v41 }
 0x54c   :  { %2058 = vmatpush1.bf16.msra.mxu0 %v2594_v39  ;;  %2090 = vmatpush1.bf16.msra.mxu1 %v2614_v49 }
 0x54d   :  { %2092 = vmatprep.subr.bf16.mxu0 %v2336_v4  ;;  %2124 = vmatprep.subr.bf16.mxu1 %v2388_v22  ;;  %v1622_v4 = vld [vmem:[%s3055_s0 + $0xb8] sm:$0xff] }
 0x54e   :  { %v1030_v53 = vadd.f32 %v1622_v4, %v2669_v5  ;;  %v1635_v4 = vld [vmem:[%s3055_s0 + $0xe0] sm:$0xff] }
 0x602   :  { %v1097_v36 = vpop.f32.mrb[10].mxu0  ;;  %v1168_v11 = vpop.f32.mrb[10].mxu1 }
 0x603   :  { %v1173_v38 = vadd.f32 %v1097_v36, %v1027_v34  ;;  %v1099_v43 = vpop.f32.mrb[11].mxu0  ;;  %v1170_v22 = vpop.f32.mrb[11].mxu1  ;;  %v1175_v63 = vadd.f32 %v1168_v11, %v1029_v56  ;;  %v1638_v56 = vld [vmem:[%s3055_s0 + $0xf8] sm:$0xff] }
 0x604   :  { %v1174_v44 = vadd.f32 %v1099_v43, %v1028_v35  ;;  %v1176_v54 = vadd.f32 %v1170_v22, %v1030_v53  ;;  %v1636_v22 = vld [vmem:[%s3055_s0 + $0xe8] sm:$0xff] }
 0x605   :  { %v1623_v50 = vmul.f32 -1.442695, %v1173_v38 }
 0x606   :  { %v1624_v51 = vmul.f32 -1.442695, %v1174_v44  ;;  %v1625_v59 = vmul.f32 -1.442695, %v1176_v54  ;;  %v1389_v44 = vadd.f32 %v1635_v4, %v2657_v57 }
 0x607   :  { %2236 = vpow2.f32 %v1623_v50  ;;  %v1390_v50 = vadd.f32 %v1636_v22, %v2662_v60 }
 0x608   :  { %2238 = vpow2.f32 %v1624_v51 }
 0x609   :  { %2240 = vpow2.f32 %v1625_v59 }
 0x60a   :  { %2242 = vtanh.f32 %v1175_v63 }
 0x611   :  { %v2237_v1 = vpop.eup %2236 }
 0x612   :  { %v2239_v2 = vpop.eup %2238  ;;  %v1180_v47 = vadd.f32 1.0, %v2237_v1 }
 0x613   :  { %v1186_v6 = vadd.f32 1.0, %v2239_v2  ;;  %v2241_v12 = vpop.eup %2240 }
 0x614   :  { %2244 = vrcp.f32 %v1180_v47  ;;  %v2243_v13 = vpop.eup %2242  ;;  %v1193_v61 = vadd.f32 1.0, %v2241_v12  ;;  %v1392_v47 = vadd.f32 %v1638_v56, %v2669_v5 }
 0x615   :  { %2246 = vrcp.f32 %v1186_v6 }
 0x616   :  { %2248 = vrcp.f32 %v1193_v61 }
 0x61e   :  { %v2245_v19 = vpop.eup %2244 }
 0x61f   :  { %v2247_v20 = vpop.eup %2246  ;;  %v1197_v21 = vmul.f32 %v2245_v19, %v2243_v13 }
 0x620   :  { %v1196_v23 = vmul.f32 %v2247_v20, %v2912_v16  ;;  %v2249_v35 = vpop.eup %2248 }
 0x622   :  { %v2969_v34 = vadd.f32 %v1197_v21, %v1196_v23 }
 0x624   :  { %2250 = vtanh.f32 %v2969_v34 }
 0x62e   :  { %v2251_v36 = vpop.eup %2250 }
 0x62f   :  { %v1200_v11 = vmul.f32 %v2251_v36, %v2249_v35 }
 0x631   :  { %1626 = vst [vmem:[%s3057_s5 + $0x28] sm:$0xff] %v1200_v11  ;;  %1277 = vmatmul.mubr.f32.vlgmr.msra.gmra.mrb[12].mxu0 %v1200_v11  ;;  %1348 = vmatmul.mubr.f32.vlgmr.msra.gmra.mrb[12].mxu1 %v1200_v11 }
 0x632   :  { %2094 = vmatpush1.bf16.msra.mxu0 %v2347_v8  ;;  %2126 = vmatpush1.bf16.msra.mxu1 %v2396_v25  ;;  %v1628_v8 = vld [vmem:[%s3055_s0 + $0xc8] sm:$0xff] }
 0x633   :  { %2096 = vmatprep.subr.bf16.mxu0 %v2349_v9  ;;  %2128 = vmatprep.subr.bf16.mxu1 %v2421_v33  ;;  %v1630_v33 = vld [vmem:[%s3055_s0 + $0xd8] sm:$0xff] }
 0x634   :  { %1457 = vmatprep.mubr.f32.mxu0 %v2284_v3  ;;  %1528 = vmatprep.mubr.f32.mxu1 %v2284_v3  ;;  %v1627_v3 = vld [vmem:[%s3055_s0 + $0xc0] sm:$0xff] }
 0x635   :  { %v1208_v9 = vadd.f32 %v1627_v3, %v2657_v57  ;;  %v1637_v57 = vld [vmem:[%s3055_s0 + $0xf0] sm:$0xff] }
 0x636   :  { %2098 = vmatpush1.bf16.msra.mxu0 %v2365_v14  ;;  %2130 = vmatpush1.bf16.msra.mxu1 %v2432_v37  ;;  %v1209_v14 = vadd.f32 %v1628_v8, %v2662_v60  ;;  %v1391_v6 = vadd.f32 %v1637_v57, %v2675_v28 }
 0x637   :  { %2100 = vmatprep.subr.bf16.mxu0 %v2374_v17  ;;  %2132 = vmatprep.subr.bf16.mxu1 %v2456_v45 }
 0x63a   :  { %2102 = vmatpush1.bf16.msra.mxu0 %v2399_v26  ;;  %2134 = vmatpush1.bf16.msra.mxu1 %v2465_v48  ;;  %v1211_v48 = vadd.f32 %v1630_v33, %v2669_v5 }
 0x63b   :  { %2104 = vmatprep.subr.bf16.mxu0 %v2412_v30  ;;  %2136 = vmatprep.subr.bf16.mxu1 %v2477_v52  ;;  %v1629_v52 = vld [vmem:[%s3055_s0 + $0xd0] sm:$0xff] }
 0x63e   :  { %2106 = vmatpush1.bf16.msra.mxu0 %v2448_v42  ;;  %2138 = vmatpush1.bf16.msra.mxu1 %v2507_v62 }
 0x63f   :  { %2108 = vmatprep.subr.bf16.mxu0 %v2459_v46  ;;  %2140 = vmatprep.subr.bf16.mxu1 %v2513_v0 }
 0x642   :  { %2110 = vmatpush1.bf16.msra.mxu0 %v2486_v55  ;;  %2142 = vmatpush1.bf16.msra.mxu1 %v2543_v15 }
 0x643   :  { %2112 = vmatprep.subr.bf16.mxu0 %v2495_v58  ;;  %2144 = vmatprep.subr.bf16.mxu1 %v2549_v18  ;;  %v1210_v58 = vadd.f32 %v1629_v52, %v2675_v28 }
 0x646   :  { %2114 = vmatpush1.bf16.msra.mxu0 %v2528_v7  ;;  %2146 = vmatpush1.bf16.msra.mxu1 %v2576_v31 }
 0x647   :  { %2116 = vmatprep.subr.bf16.mxu0 %v2531_v10  ;;  %2148 = vmatprep.subr.bf16.mxu1 %v2579_v32 }
 0x64a   :  { %2118 = vmatpush1.bf16.msra.mxu0 %v2564_v24  ;;  %2150 = vmatpush1.bf16.msra.mxu1 %v2598_v40 }
 0x64b   :  { %2120 = vmatprep.subr.bf16.mxu0 %v2567_v27  ;;  %2152 = vmatprep.subr.bf16.mxu1 %v2601_v41 }
 0x64e   :  { %2122 = vmatpush1.bf16.msra.mxu0 %v2594_v39  ;;  %2154 = vmatpush1.bf16.msra.mxu1 %v2614_v49 }
 0x704   :  { %v1278_v17 = vpop.f32.mrb[12].mxu0  ;;  %v1349_v25 = vpop.f32.mrb[12].mxu1 }
 0x705   :  { %v1354_v26 = vadd.f32 %v1278_v17, %v1208_v9  ;;  %v1280_v30 = vpop.f32.mrb[13].mxu0  ;;  %v1351_v37 = vpop.f32.mrb[13].mxu1  ;;  %v1356_v0 = vadd.f32 %v1349_v25, %v1210_v58 }
 0x706   :  { %v1355_v42 = vadd.f32 %v1280_v30, %v1209_v14  ;;  %v1357_v55 = vadd.f32 %v1351_v37, %v1211_v48 }
 0x707   :  { %v1631_v45 = vmul.f32 -1.442695, %v1354_v26 }
 0x708   :  { %v1632_v46 = vmul.f32 -1.442695, %v1355_v42  ;;  %v1633_v62 = vmul.f32 -1.442695, %v1357_v55 }
 0x709   :  { %2252 = vpow2.f32 %v1631_v45 }
 0x70a   :  { %2254 = vpow2.f32 %v1632_v46 }
 0x70b   :  { %2256 = vpow2.f32 %v1633_v62 }
 0x70c   :  { %2258 = vtanh.f32 %v1356_v0 }
 0x713   :  { %v2253_v7 = vpop.eup %2252 }
 0x714   :  { %v2255_v10 = vpop.eup %2254  ;;  %v1361_v15 = vadd.f32 1.0, %v2253_v7 }
 0x715   :  { %v1367_v18 = vadd.f32 1.0, %v2255_v10  ;;  %v2257_v24 = vpop.eup %2256 }
 0x716   :  { %2260 = vrcp.f32 %v1361_v15  ;;  %v2259_v27 = vpop.eup %2258  ;;  %v1374_v40 = vadd.f32 1.0, %v2257_v24 }
 0x717   :  { %2262 = vrcp.f32 %v1367_v18 }
 0x718   :  { %2264 = vrcp.f32 %v1374_v40 }
 0x720   :  { %v2261_v31 = vpop.eup %2260 }
 0x721   :  { %v2263_v32 = vpop.eup %2262  ;;  %v1378_v39 = vmul.f32 %v2261_v31, %v2259_v27 }
 0x722   :  { %v1377_v41 = vmul.f32 %v2263_v32, %v2969_v34  ;;  %v2265_v16 = vpop.eup %2264 }
 0x724   :  { %v1379_v49 = vadd.f32 %v1378_v39, %v1377_v41 }
 0x726   :  { %2266 = vtanh.f32 %v1379_v49 }
 0x730   :  { %v2267_v38 = vpop.eup %2266 }
 0x731   :  { %v1381_v43 = vmul.f32 %v2267_v38, %v2265_v16 }
 0x733   :  { %1634 = vst [vmem:[%s3057_s5 + $0x30] sm:$0xff] %v1381_v43  ;;  %1458 = vmatmul.mubr.f32.vlgmr.msra.gmra.mrb[14].mxu0 %v1381_v43  ;;  %1529 = vmatmul.mubr.f32.vlgmr.msra.gmra.mrb[14].mxu1 %v1381_v43 }
 0x806   :  { %v1459_v51 = vpop.f32.mrb[14].mxu0  ;;  %v1530_v53 = vpop.f32.mrb[14].mxu1 }
 0x807   :  { %v1535_v29 = vadd.f32 %v1459_v51, %v1389_v44  ;;  %v1461_v54 = vpop.f32.mrb[15].mxu0  ;;  %v1532_v59 = vpop.f32.mrb[15].mxu1  ;;  %v1537_v13 = vadd.f32 %v1530_v53, %v1391_v6 }
 0x808   :  { %v1536_v63 = vadd.f32 %v1461_v54, %v1390_v50  ;;  %v1538_v60 = vadd.f32 %v1532_v59, %v1392_v47 }
 0x809   :  { %v1639_v1 = vmul.f32 -1.442695, %v1535_v29 }
 0x80a   :  { %v1640_v2 = vmul.f32 -1.442695, %v1536_v63  ;;  %v1641_v12 = vmul.f32 -1.442695, %v1538_v60 }
 0x80b   :  { %2268 = vpow2.f32 %v1639_v1 }
 0x80c   :  { %2270 = vpow2.f32 %v1640_v2 }
 0x80d   :  { %2272 = vpow2.f32 %v1641_v12 }
 0x80e   :  { %2274 = vtanh.f32 %v1537_v13 }
 0x815   :  { %v2269_v19 = vpop.eup %2268 }
 0x816   :  { %v2271_v20 = vpop.eup %2270  ;;  %v1542_v21 = vadd.f32 1.0, %v2269_v19 }
 0x817   :  { %v1548_v61 = vadd.f32 1.0, %v2271_v20  ;;  %v2273_v5 = vpop.eup %2272 }
 0x818   :  { %2276 = vrcp.f32 %v1542_v21  ;;  %v2275_v23 = vpop.eup %2274  ;;  %v1555_v11 = vadd.f32 1.0, %v2273_v5 }
 0x819   :  { %2278 = vrcp.f32 %v1548_v61 }
 0x81a   :  { %2280 = vrcp.f32 %v1555_v11 }
 0x822   :  { %v2277_v34 = vpop.eup %2276 }
 0x823   :  { %v2279_v35 = vpop.eup %2278  ;;  %v1559_v36 = vmul.f32 %v2277_v34, %v2275_v23 }
 0x824   :  { %v1558_v3 = vmul.f32 %v2279_v35, %v1379_v49  ;;  %v2281_v28 = vpop.eup %2280 }
 0x826   :  { %v1560_v8 = vadd.f32 %v1559_v36, %v1558_v3 }
 0x828   :  { %2282 = vtanh.f32 %v1560_v8  ;;  %1571 = vst [vmem:[%s3058_s7] sm:$0xff] %v1560_v8 }
 0x832   :  { %v2283_v9 = vpop.eup %2282 }
 0x833   :  { %v1562_v14 = vmul.f32 %v2283_v9, %v2281_v28 }
 0x835   :  { %1642 = vst [vmem:[%s3057_s5 + $0x38] sm:$0xff] %v1562_v14  ;;  %1570 = vst [vmem:[%s3059_s6] sm:$0xff] %v1562_v14 }

</bundles_post_ra>
